<compile_context>
chip_gen: v7x
topology: tpu7x:2x2x1
jax: 0.10.0
libtpu: 0.0.40
codegen_flags: <defaults>
</compile_context>

<pallas_src>
import jax
import jax.numpy as jnp
import numpy as np
from jax.experimental import pallas as pl
from jax.experimental.pallas import tpu as pltpu

NUM_GROUPS = 32   # normalization(channels) == GroupNorm32(32, channels)
GN_EPS = 1e-5


def _group_norm_silu(h, gamma, beta):
    """GroupNorm(32) + SiLU on an [H, W, C] array (C on lanes), f32 math.

    Two-pass (subtract-mean) reduction to avoid E[x^2]-E[x]^2 cancellation.
    gamma / beta: [1, C].
    """
    H, W, C = h.shape
    G = NUM_GROUPS
    Cg = C // G
    n = float(H * W * Cg)

    # pass 1: per-group mean
    s1 = jnp.sum(jnp.sum(h, axis=0, keepdims=True), axis=1, keepdims=True)   # [1,1,C]
    mu_g = jnp.sum(s1.reshape(1, G, Cg), axis=-1) * (1.0 / n)                # [1,G]
    mu = jnp.broadcast_to(mu_g[:, :, None], (1, G, Cg)).reshape(1, 1, C)

    # pass 2: centered variance
    d = h - mu
    s2 = jnp.sum(jnp.sum(d * d, axis=0, keepdims=True), axis=1, keepdims=True)
    var_g = jnp.sum(s2.reshape(1, G, Cg), axis=-1) * (1.0 / n)               # biased (torch)
    inv_g = jax.lax.rsqrt(var_g + GN_EPS)
    inv = jnp.broadcast_to(inv_g[:, :, None], (1, G, Cg)).reshape(1, 1, C)

    hn = d * inv * gamma.reshape(1, 1, C) + beta.reshape(1, 1, C)
    return hn * jax.nn.sigmoid(hn)                                           # SiLU


def _conv3x3_im2col(hpad_ref, w_ref, bias, H, W, Cin, Cout):
    """3x3 / pad=1 conv as ONE im2col matmul on the MXU.

    Builds a [H*W, 9*Cin] slab from the zero-halo padded VMEM buffer, casts the
    operands to bf16 and accumulates in f32.  Weight layout: [9*Cin, Cout] with
    rows ordered (kh, kw, Cin).
    """
    cols = [hpad_ref[dy:dy + H, dx:dx + W, :].reshape(H * W, Cin)
            for dy in range(3) for dx in range(3)]                # 9 shifted windows
    slab = jnp.concatenate(cols, axis=-1).astype(jnp.bfloat16)    # [H*W, 9*Cin]
    acc = jnp.dot(slab, w_ref[...], preferred_element_type=jnp.float32)
    return acc + bias                                             # [H*W, Cout] f32


def _resblock_kernel(x_ref, ebias_ref,
                     gn1_w_ref, gn1_b_ref, w1_ref, b1_ref,
                     gn2_w_ref, gn2_b_ref, w2_ref, b2_ref,
                     out_ref,
                     hpad_ref):
    _, H, W, C = x_ref.shape
    Cout = out_ref.shape[-1]

    x = x_ref[0]                                    # [H, W, C] f32, this batch element

    # Zero ONLY the halo border of the padded scratch.  The interior is fully
    # overwritten before each conv and the halo stays zero in between, so no
    # second full-buffer zeroing is needed.
    zrow = jnp.zeros((1, W + 2, C), hpad_ref.dtype)
    hpad_ref[0:1, :, :] = zrow
    hpad_ref[H + 1:H + 2, :, :] = zrow
    zcol = jnp.zeros((H + 2, 1, C), hpad_ref.dtype)
    hpad_ref[:, 0:1, :] = zcol
    hpad_ref[:, W + 1:W + 2, :] = zcol

    # ---- in_layers: GroupNorm32 -> SiLU -> Conv3x3 (im2col, bf16 MXU) ----------
    h = _group_norm_silu(x, gn1_w_ref[...], gn1_b_ref[...])
    hpad_ref[1:H + 1, 1:W + 1, :] = h
    h = _conv3x3_im2col(hpad_ref, w1_ref, b1_ref[...], H, W, C, Cout)   # [H*W, Cout]

    # ---- emb_layers: SiLU -> Linear computed in the wrapper; broadcast add -----
    h = h + ebias_ref[0]                                                 # [1, Cout]

    # ---- out_layers: GroupNorm32 -> SiLU -> Dropout(identity, eval) -> Conv3x3 -
    h = _group_norm_silu(h.reshape(H, W, Cout), gn2_w_ref[...], gn2_b_ref[...])
    hpad_ref[1:H + 1, 1:W + 1, :] = h
    h = _conv3x3_im2col(hpad_ref, w2_ref, b2_ref[...], H, W, Cout, Cout)

    # ---- skip connection (Identity since out_channels == channels) -------------
    out_ref[0] = (x + h.reshape(H, W, Cout)).astype(out_ref.dtype)


def resblock_forward(x_nchw, emb, params):
    """Wrapper: NCHW in / NCHW out (PyTorch convention).

    The Pallas kernel runs in NHWC, one batch element per grid step
    ("parallel" -> megacore sharding on v7x, per-step DMA/compute overlap on
    all generations).
    """
    B, C, H, W = x_nchw.shape
    Cout = params["conv1_w"].shape[0]
    assert Cout == C, "only the default out_channels==channels path is implemented"
    assert C % NUM_GROUPS == 0
    # TODO(synk): up/down resampling, use_conv skip and use_scale_shift_norm
    #             variants of the module are not implemented.
    # TODO(synk): for C < 128 a (W*C)-flattened lane layout (dx shift via
    #             pltpu.roll) would make stores lane-dense; for C >= 256 tile
    #             Cout to the MXU width. Not needed at these toy shapes.

    x_nhwc = jnp.transpose(x_nchw, (0, 2, 3, 1)).astype(jnp.float32)

    # emb_layers (SiLU -> Linear) hoisted out of the kernel: a [B,E]x[E,Cout]
    # matmul is too small to be worth an in-kernel MXU weight load.
    e = jax.nn.silu(emb.astype(jnp.float32))
    ebias = e @ jnp.transpose(params["lin_w"], (1, 0)).astype(jnp.float32)
    ebias = (ebias + params["lin_b"].astype(jnp.float32)).reshape(B, 1, Cout)

    # Conv weights: OIHW -> [kh*kw*Cin, Cout] (im2col layout), bf16 for the MXU.
    c1w = jnp.transpose(params["conv1_w"], (2, 3, 1, 0)).reshape(9 * C, Cout)
    c2w = jnp.transpose(params["conv2_w"], (2, 3, 1, 0)).reshape(9 * Cout, Cout)
    c1w = c1w.astype(jnp.bfloat16)
    c2w = c2w.astype(jnp.bfloat16)
    to2d = lambda v: v.reshape(1, -1).astype(jnp.float32)

    # Weights/biases: same (full) block every grid step -> stay VMEM-resident.
    def rep(shape):
        return pl.BlockSpec(shape, lambda b, _s=shape: (0,) * len(_s))

    out_nhwc = pl.pallas_call(
        _resblock_kernel,
        out_shape=jax.ShapeDtypeStruct((B, H, W, Cout), jnp.float32),
        grid=(B,),
        in_specs=[
            pl.BlockSpec((1, H, W, C), lambda b: (b, 0, 0, 0)),     # x (per-sample)
            pl.BlockSpec((1, 1, Cout), lambda b: (b, 0, 0)),        # emb bias (per-sample)
            rep((1, C)), rep((1, C)),                               # gn1 gamma/beta
            rep((9 * C, Cout)), rep((1, Cout)),                     # conv1 w (bf16) / b
            rep((1, Cout)), rep((1, Cout)),                         # gn2 gamma/beta
            rep((9 * Cout, Cout)), rep((1, Cout)),                  # conv2 w (bf16) / b
        ],
        out_specs=pl.BlockSpec((1, H, W, Cout), lambda b: (b, 0, 0, 0)),
        scratch_shapes=[pltpu.VMEM((H + 2, W + 2, C), jnp.float32)],
        compiler_params=pltpu.CompilerParams(
            dimension_semantics=("parallel",),
            vmem_limit_bytes=48 * 1024 * 1024),
    )(x_nhwc, ebias,
      to2d(params["gn1_w"]), to2d(params["gn1_b"]), c1w, to2d(params["conv1_b"]),
      to2d(params["gn2_w"]), to2d(params["gn2_b"]), c2w, to2d(params["conv2_b"]))

    return jnp.transpose(out_nhwc, (0, 3, 1, 2))


# ---------------- pure-JAX reference (mirrors the PyTorch forward) ----------------
def resblock_reference(x, emb, p):
    def gn(h, w, b):
        N, C, H, W = h.shape
        hg = h.reshape(N, NUM_GROUPS, C // NUM_GROUPS, H, W)
        m = hg.mean(axis=(2, 3, 4), keepdims=True)
        v = ((hg - m) ** 2).mean(axis=(2, 3, 4), keepdims=True)
        hn = ((hg - m) / jnp.sqrt(v + GN_EPS)).reshape(N, C, H, W)
        return hn * w[None, :, None, None] + b[None, :, None, None]

    def conv3(h, w, b):
        y = jax.lax.conv_general_dilated(
            h, w, window_strides=(1, 1), padding=((1, 1), (1, 1)),
            dimension_numbers=("NCHW", "OIHW", "NCHW"))
        return y + b[None, :, None, None]

    silu = jax.nn.silu
    h = conv3(silu(gn(x, p["gn1_w"], p["gn1_b"])), p["conv1_w"], p["conv1_b"])
    e = silu(emb) @ p["lin_w"].T + p["lin_b"]
    h = h + e[:, :, None, None]
    h = conv3(silu(gn(h, p["gn2_w"], p["gn2_b"])), p["conv2_w"], p["conv2_b"])
    return x + h


if __name__ == "__main__":
    B, C, H, W = 2, 32, 8, 8        # channels must be divisible by 32 (GroupNorm32)
    E = 16                           # emb_channels
    Cout = C                         # default: out_channels == channels

    key = jax.random.PRNGKey(0)
    ks = jax.random.split(key, 8)

    x = jax.random.normal(ks[0], (B, C, H, W), jnp.float32)
    emb = jax.random.normal(ks[1], (B, E), jnp.float32)

    # Deterministic synthetic parameters (shapes from the module's __init__).
    # NOTE: the original zero_module() zero-inits conv2; we use small random
    # values here so the full kernel path is exercised.
    params = {
        "gn1_w": jnp.ones((C,), jnp.float32),
        "gn1_b": jnp.zeros((C,), jnp.float32),
        "conv1_w": 0.1 * jax.random.normal(ks[2], (Cout, C, 3, 3), jnp.float32),
        "conv1_b": 0.1 * jax.random.normal(ks[3], (Cout,), jnp.float32),
        "lin_w": 0.1 * jax.random.normal(ks[4], (Cout, E), jnp.float32),
        "lin_b": jnp.zeros((Cout,), jnp.float32),
        "gn2_w": jnp.ones((Cout,), jnp.float32),
        "gn2_b": jnp.zeros((Cout,), jnp.float32),
        "conv2_w": 0.1 * jax.random.normal(ks[5], (Cout, Cout, 3, 3), jnp.float32),
        "conv2_b": 0.1 * jax.random.normal(ks[6], (Cout,), jnp.float32),
    }

    out = resblock_forward(x, emb, params)
    out = jax.block_until_ready(out)

    ref = jax.block_until_ready(resblock_reference(x, emb, params))
    # Conv operands run in bf16 (f32 accumulation) -> tolerance relaxed vs pure f32.
    np.testing.assert_allclose(np.asarray(out), np.asarray(ref), rtol=3e-2, atol=3e-2)

    print("KERNEL_OK")
</pallas_src>

<mosaic_0001>
module attributes {stable_mosaic.version = 11 : i64} {
  func.func @_resblock_kernel(%arg0: i32, %arg1: memref<1x8x8x32xf32, #tpu.memory_space<vmem>>, %arg2: memref<1x1x32xf32, #tpu.memory_space<vmem>>, %arg3: memref<1x32xf32, #tpu.memory_space<vmem>>, %arg4: memref<1x32xf32, #tpu.memory_space<vmem>>, %arg5: memref<288x32xbf16, #tpu.memory_space<vmem>>, %arg6: memref<1x32xf32, #tpu.memory_space<vmem>>, %arg7: memref<1x32xf32, #tpu.memory_space<vmem>>, %arg8: memref<1x32xf32, #tpu.memory_space<vmem>>, %arg9: memref<288x32xbf16, #tpu.memory_space<vmem>>, %arg10: memref<1x32xf32, #tpu.memory_space<vmem>>, %arg11: memref<1x8x8x32xf32, #tpu.memory_space<vmem>>, %arg12: memref<10x10x32xf32, #tpu.memory_space<vmem>>) attributes {dimension_semantics = [#tpu.dimension_semantics<parallel>], iteration_bounds = array<i64: 2>, scalar_prefetch = 0 : i64, scratch_operands = 1 : i64, tpu.core_type = #tpu.core_type<tc>, window_params = [{transform_indices = @transform_0, window_bounds = array<i64: 1, 8, 8, 32>}, {transform_indices = @transform_1, window_bounds = array<i64: 1, 1, 32>}, {pipeline_mode = #tpu.pipeline_mode<synchronous>, transform_indices = @transform_2, window_bounds = array<i64: 1, 32>}, {pipeline_mode = #tpu.pipeline_mode<synchronous>, transform_indices = @transform_3, window_bounds = array<i64: 1, 32>}, {pipeline_mode = #tpu.pipeline_mode<synchronous>, transform_indices = @transform_4, window_bounds = array<i64: 288, 32>}, {pipeline_mode = #tpu.pipeline_mode<synchronous>, transform_indices = @transform_5, window_bounds = array<i64: 1, 32>}, {pipeline_mode = #tpu.pipeline_mode<synchronous>, transform_indices = @transform_6, window_bounds = array<i64: 1, 32>}, {pipeline_mode = #tpu.pipeline_mode<synchronous>, transform_indices = @transform_7, window_bounds = array<i64: 1, 32>}, {pipeline_mode = #tpu.pipeline_mode<synchronous>, transform_indices = @transform_8, window_bounds = array<i64: 288, 32>}, {pipeline_mode = #tpu.pipeline_mode<synchronous>, transform_indices = @transform_9, window_bounds = array<i64: 1, 32>}, {transform_indices = @transform_10, window_bounds = array<i64: 1, 8, 8, 32>}]} {
    %c0 = arith.constant 0 : index
    %c0_0 = arith.constant 0 : index
    %c0_1 = arith.constant 0 : index
    %c0_2 = arith.constant 0 : index
    %0 = vector.load %arg1[%c0, %c0_0, %c0_1, %c0_2] : memref<1x8x8x32xf32, #tpu.memory_space<vmem>>, vector<1x8x8x32xf32>
    %1 = vector.shape_cast %0 : vector<1x8x8x32xf32> to vector<8x8x32xf32>
    %cst = arith.constant 0.000000e+00 : f32
    %2 = vector.broadcast %cst : f32 to vector<1x10x32xf32>
    %c0_3 = arith.constant 0 : index
    %c0_4 = arith.constant 0 : index
    %c0_5 = arith.constant 0 : index
    %3 = vector.load %arg12[%c0_3, %c0_4, %c0_5] : memref<10x10x32xf32, #tpu.memory_space<vmem>>, vector<1x10x32xf32>
    tpu.vector_store %arg12[%c0_3, %c0_4, %c0_5], %2 {strides = array<i32>} : memref<10x10x32xf32, #tpu.memory_space<vmem>>, vector<1x10x32xf32>,
    %c9 = arith.constant 9 : index
    %c0_6 = arith.constant 0 : index
    %c0_7 = arith.constant 0 : index
    %4 = vector.load %arg12[%c9, %c0_6, %c0_7] : memref<10x10x32xf32, #tpu.memory_space<vmem>>, vector<1x10x32xf32>
    tpu.vector_store %arg12[%c9, %c0_6, %c0_7], %2 {strides = array<i32>} : memref<10x10x32xf32, #tpu.memory_space<vmem>>, vector<1x10x32xf32>,
    %cst_8 = arith.constant 0.000000e+00 : f32
    %5 = vector.broadcast %cst_8 : f32 to vector<10x1x32xf32>
    %c0_9 = arith.constant 0 : index
    %c0_10 = arith.constant 0 : index
    %c0_11 = arith.constant 0 : index
    %6 = vector.load %arg12[%c0_9, %c0_10, %c0_11] : memref<10x10x32xf32, #tpu.memory_space<vmem>>, vector<10x1x32xf32>
    tpu.vector_store %arg12[%c0_9, %c0_10, %c0_11], %5 {strides = array<i32>} : memref<10x10x32xf32, #tpu.memory_space<vmem>>, vector<10x1x32xf32>,
    %c0_12 = arith.constant 0 : index
    %c9_13 = arith.constant 9 : index
    %c0_14 = arith.constant 0 : index
    %7 = vector.load %arg12[%c0_12, %c9_13, %c0_14] : memref<10x10x32xf32, #tpu.memory_space<vmem>>, vector<10x1x32xf32>
    tpu.vector_store %arg12[%c0_12, %c9_13, %c0_14], %5 {strides = array<i32>} : memref<10x10x32xf32, #tpu.memory_space<vmem>>, vector<10x1x32xf32>,
    %c0_15 = arith.constant 0 : index
    %c0_16 = arith.constant 0 : index
    %8 = vector.load %arg3[%c0_15, %c0_16] : memref<1x32xf32, #tpu.memory_space<vmem>>, vector<1x32xf32>
    %c0_17 = arith.constant 0 : index
    %c0_18 = arith.constant 0 : index
    %9 = vector.load %arg4[%c0_17, %c0_18] : memref<1x32xf32, #tpu.memory_space<vmem>>, vector<1x32xf32>
    %cst_19 = arith.constant dense<0.000000e+00> : vector<8x32xf32>
    %10 = vector.multi_reduction <add>, %1, %cst_19 [0] : vector<8x8x32xf32> to vector<8x32xf32>
    %11 = vector.shape_cast %10 : vector<8x32xf32> to vector<1x8x32xf32>
    %cst_20 = arith.constant dense<0.000000e+00> : vector<1x32xf32>
    %12 = vector.multi_reduction <add>, %11, %cst_20 [1] : vector<1x8x32xf32> to vector<1x32xf32>
    %13 = vector.shape_cast %12 : vector<1x32xf32> to vector<1x1x32xf32>
    %14 = vector.shape_cast %13 : vector<1x1x32xf32> to vector<1x32x1xf32>
    %cst_21 = arith.constant dense<0.000000e+00> : vector<1x32xf32>
    %15 = vector.multi_reduction <add>, %14, %cst_21 [2] : vector<1x32x1xf32> to vector<1x32xf32>
    %cst_22 = arith.constant 1.562500e-02 : f32
    %16 = vector.broadcast %cst_22 : f32 to vector<1x32xf32>
    %17 = arith.mulf %15, %16 : vector<1x32xf32>
    %18 = vector.shape_cast %17 : vector<1x32xf32> to vector<1x32x1xf32>
    %19 = vector.shape_cast %18 : vector<1x32x1xf32> to vector<1x1x32xf32>
    %20 = vector.broadcast %19 : vector<1x1x32xf32> to vector<8x8x32xf32>
    %21 = arith.subf %1, %20 : vector<8x8x32xf32>
    %22 = arith.mulf %21, %21 : vector<8x8x32xf32>
    %cst_23 = arith.constant dense<0.000000e+00> : vector<8x32xf32>
    %23 = vector.multi_reduction <add>, %22, %cst_23 [0] : vector<8x8x32xf32> to vector<8x32xf32>
    %24 = vector.shape_cast %23 : vector<8x32xf32> to vector<1x8x32xf32>
    %cst_24 = arith.constant dense<0.000000e+00> : vector<1x32xf32>
    %25 = vector.multi_reduction <add>, %24, %cst_24 [1] : vector<1x8x32xf32> to vector<1x32xf32>
    %26 = vector.shape_cast %25 : vector<1x32xf32> to vector<1x1x32xf32>
    %27 = vector.shape_cast %26 : vector<1x1x32xf32> to vector<1x32x1xf32>
    %cst_25 = arith.constant dense<0.000000e+00> : vector<1x32xf32>
    %28 = vector.multi_reduction <add>, %27, %cst_25 [2] : vector<1x32x1xf32> to vector<1x32xf32>
    %cst_26 = arith.constant 1.562500e-02 : f32
    %29 = vector.broadcast %cst_26 : f32 to vector<1x32xf32>
    %30 = arith.mulf %28, %29 : vector<1x32xf32>
    %cst_27 = arith.constant 9.99999974E-6 : f32
    %31 = vector.broadcast %cst_27 : f32 to vector<1x32xf32>
    %32 = arith.addf %30, %31 : vector<1x32xf32>
    %33 = math.rsqrt %32 : vector<1x32xf32>
    %34 = vector.shape_cast %33 : vector<1x32xf32> to vector<1x32x1xf32>
    %35 = vector.shape_cast %34 : vector<1x32x1xf32> to vector<1x1x32xf32>
    %36 = vector.broadcast %35 : vector<1x1x32xf32> to vector<8x8x32xf32>
    %37 = arith.mulf %21, %36 : vector<8x8x32xf32>
    %38 = vector.shape_cast %8 : vector<1x32xf32> to vector<1x1x32xf32>
    %39 = vector.broadcast %38 : vector<1x1x32xf32> to vector<8x8x32xf32>
    %40 = arith.mulf %37, %39 : vector<8x8x32xf32>
    %41 = vector.shape_cast %9 : vector<1x32xf32> to vector<1x1x32xf32>
    %42 = vector.broadcast %41 : vector<1x1x32xf32> to vector<8x8x32xf32>
    %43 = arith.addf %40, %42 : vector<8x8x32xf32>
    %44 = arith.negf %43 : vector<8x8x32xf32>
    %45 = math.exp %44 : vector<8x8x32xf32>
    %cst_28 = arith.constant 1.000000e+00 : f32
    %46 = vector.broadcast %cst_28 : f32 to vector<8x8x32xf32>
    %47 = arith.addf %46, %45 : vector<8x8x32xf32>
    %48 = arith.divf %46, %47 : vector<8x8x32xf32>
    %49 = arith.mulf %43, %48 : vector<8x8x32xf32>
    %c1 = arith.constant 1 : index
    %c1_29 = arith.constant 1 : index
    %c0_30 = arith.constant 0 : index
    %50 = vector.load %arg12[%c1, %c1_29, %c0_30] : memref<10x10x32xf32, #tpu.memory_space<vmem>>, vector<8x8x32xf32>
    tpu.vector_store %arg12[%c1, %c1_29, %c0_30], %49 {strides = array<i32>} : memref<10x10x32xf32, #tpu.memory_space<vmem>>, vector<8x8x32xf32>,
    %c0_31 = arith.constant 0 : index
    %c0_32 = arith.constant 0 : index
    %51 = vector.load %arg6[%c0_31, %c0_32] : memref<1x32xf32, #tpu.memory_space<vmem>>, vector<1x32xf32>
    %c0_33 = arith.constant 0 : index
    %c0_34 = arith.constant 0 : index
    %c0_35 = arith.constant 0 : index
    %52 = vector.load %arg12[%c0_33, %c0_34, %c0_35] : memref<10x10x32xf32, #tpu.memory_space<vmem>>, vector<8x8x32xf32>
    %53 = vector.shape_cast %52 : vector<8x8x32xf32> to vector<64x32xf32>
    %c0_36 = arith.constant 0 : index
    %c1_37 = arith.constant 1 : index
    %c0_38 = arith.constant 0 : index
    %54 = vector.load %arg12[%c0_36, %c1_37, %c0_38] : memref<10x10x32xf32, #tpu.memory_space<vmem>>, vector<8x8x32xf32>
    %55 = vector.shape_cast %54 : vector<8x8x32xf32> to vector<64x32xf32>
    %c0_39 = arith.constant 0 : index
    %c2 = arith.constant 2 : index
    %c0_40 = arith.constant 0 : index
    %56 = vector.load %arg12[%c0_39, %c2, %c0_40] : memref<10x10x32xf32, #tpu.memory_space<vmem>>, vector<8x8x32xf32>
    %57 = vector.shape_cast %56 : vector<8x8x32xf32> to vector<64x32xf32>
    %c1_41 = arith.constant 1 : index
    %c0_42 = arith.constant 0 : index
    %c0_43 = arith.constant 0 : index
    %58 = vector.load %arg12[%c1_41, %c0_42, %c0_43] : memref<10x10x32xf32, #tpu.memory_space<vmem>>, vector<8x8x32xf32>
    %59 = vector.shape_cast %58 : vector<8x8x32xf32> to vector<64x32xf32>
    %c1_44 = arith.constant 1 : index
    %c1_45 = arith.constant 1 : index
    %c0_46 = arith.constant 0 : index
    %60 = vector.load %arg12[%c1_44, %c1_45, %c0_46] : memref<10x10x32xf32, #tpu.memory_space<vmem>>, vector<8x8x32xf32>
    %61 = vector.shape_cast %60 : vector<8x8x32xf32> to vector<64x32xf32>
    %c1_47 = arith.constant 1 : index
    %c2_48 = arith.constant 2 : index
    %c0_49 = arith.constant 0 : index
    %62 = vector.load %arg12[%c1_47, %c2_48, %c0_49] : memref<10x10x32xf32, #tpu.memory_space<vmem>>, vector<8x8x32xf32>
    %63 = vector.shape_cast %62 : vector<8x8x32xf32> to vector<64x32xf32>
    %c2_50 = arith.constant 2 : index
    %c0_51 = arith.constant 0 : index
    %c0_52 = arith.constant 0 : index
    %64 = vector.load %arg12[%c2_50, %c0_51, %c0_52] : memref<10x10x32xf32, #tpu.memory_space<vmem>>, vector<8x8x32xf32>
    %65 = vector.shape_cast %64 : vector<8x8x32xf32> to vector<64x32xf32>
    %c2_53 = arith.constant 2 : index
    %c1_54 = arith.constant 1 : index
    %c0_55 = arith.constant 0 : index
    %66 = vector.load %arg12[%c2_53, %c1_54, %c0_55] : memref<10x10x32xf32, #tpu.memory_space<vmem>>, vector<8x8x32xf32>
    %67 = vector.shape_cast %66 : vector<8x8x32xf32> to vector<64x32xf32>
    %c2_56 = arith.constant 2 : index
    %c2_57 = arith.constant 2 : index
    %c0_58 = arith.constant 0 : index
    %68 = vector.load %arg12[%c2_56, %c2_57, %c0_58] : memref<10x10x32xf32, #tpu.memory_space<vmem>>, vector<8x8x32xf32>
    %69 = vector.shape_cast %68 : vector<8x8x32xf32> to vector<64x32xf32>
    %70 = tpu.concatenate %53, %55, %57, %59, %61, %63, %65, %67, %69 in 1 : vector<64x32xf32>, vector<64x32xf32>, vector<64x32xf32>, vector<64x32xf32>, vector<64x32xf32>, vector<64x32xf32>, vector<64x32xf32>, vector<64x32xf32>, vector<64x32xf32> -> vector<64x288xf32>
    %71 = arith.truncf %70 : vector<64x288xf32> to vector<64x288xbf16>
    %c0_59 = arith.constant 0 : index
    %c0_60 = arith.constant 0 : index
    %72 = vector.load %arg5[%c0_59, %c0_60] : memref<288x32xbf16, #tpu.memory_space<vmem>>, vector<288x32xbf16>
    %cst_61 = arith.constant dense<0.000000e+00> : vector<64x32xf32>
    %73 = tpu.matmul %71, %72, %cst_61 {dimension_numbers = #tpu.dot_dimension_numbers<[1], [0], [0], [1], [0, 0, 1, 1], [], []>} : vector<64x288xbf16>, vector<288x32xbf16>, vector<64x32xf32> -> vector<64x32xf32>
    %74 = vector.broadcast %51 : vector<1x32xf32> to vector<64x32xf32>
    %75 = arith.addf %73, %74 : vector<64x32xf32>
    %c0_62 = arith.constant 0 : index
    %c0_63 = arith.constant 0 : index
    %c0_64 = arith.constant 0 : index
    %76 = vector.load %arg2[%c0_62, %c0_63, %c0_64] : memref<1x1x32xf32, #tpu.memory_space<vmem>>, vector<1x1x32xf32>
    %77 = vector.shape_cast %76 : vector<1x1x32xf32> to vector<1x32xf32>
    %78 = vector.broadcast %77 : vector<1x32xf32> to vector<64x32xf32>
    %79 = arith.addf %75, %78 : vector<64x32xf32>
    %80 = vector.shape_cast %79 : vector<64x32xf32> to vector<8x8x32xf32>
    %c0_65 = arith.constant 0 : index
    %c0_66 = arith.constant 0 : index
    %81 = vector.load %arg7[%c0_65, %c0_66] : memref<1x32xf32, #tpu.memory_space<vmem>>, vector<1x32xf32>
    %c0_67 = arith.constant 0 : index
    %c0_68 = arith.constant 0 : index
    %82 = vector.load %arg8[%c0_67, %c0_68] : memref<1x32xf32, #tpu.memory_space<vmem>>, vector<1x32xf32>
    %cst_69 = arith.constant dense<0.000000e+00> : vector<8x32xf32>
    %83 = vector.multi_reduction <add>, %80, %cst_69 [0] : vector<8x8x32xf32> to vector<8x32xf32>
    %84 = vector.shape_cast %83 : vector<8x32xf32> to vector<1x8x32xf32>
    %cst_70 = arith.constant dense<0.000000e+00> : vector<1x32xf32>
    %85 = vector.multi_reduction <add>, %84, %cst_70 [1] : vector<1x8x32xf32> to vector<1x32xf32>
    %86 = vector.shape_cast %85 : vector<1x32xf32> to vector<1x1x32xf32>
    %87 = vector.shape_cast %86 : vector<1x1x32xf32> to vector<1x32x1xf32>
    %cst_71 = arith.constant dense<0.000000e+00> : vector<1x32xf32>
    %88 = vector.multi_reduction <add>, %87, %cst_71 [2] : vector<1x32x1xf32> to vector<1x32xf32>
    %cst_72 = arith.constant 1.562500e-02 : f32
    %89 = vector.broadcast %cst_72 : f32 to vector<1x32xf32>
    %90 = arith.mulf %88, %89 : vector<1x32xf32>
    %91 = vector.shape_cast %90 : vector<1x32xf32> to vector<1x32x1xf32>
    %92 = vector.shape_cast %91 : vector<1x32x1xf32> to vector<1x1x32xf32>
    %93 = vector.broadcast %92 : vector<1x1x32xf32> to vector<8x8x32xf32>
    %94 = arith.subf %80, %93 : vector<8x8x32xf32>
    %95 = arith.mulf %94, %94 : vector<8x8x32xf32>
    %cst_73 = arith.constant dense<0.000000e+00> : vector<8x32xf32>
    %96 = vector.multi_reduction <add>, %95, %cst_73 [0] : vector<8x8x32xf32> to vector<8x32xf32>
    %97 = vector.shape_cast %96 : vector<8x32xf32> to vector<1x8x32xf32>
    %cst_74 = arith.constant dense<0.000000e+00> : vector<1x32xf32>
    %98 = vector.multi_reduction <add>, %97, %cst_74 [1] : vector<1x8x32xf32> to vector<1x32xf32>
    %99 = vector.shape_cast %98 : vector<1x32xf32> to vector<1x1x32xf32>
    %100 = vector.shape_cast %99 : vector<1x1x32xf32> to vector<1x32x1xf32>
    %cst_75 = arith.constant dense<0.000000e+00> : vector<1x32xf32>
    %101 = vector.multi_reduction <add>, %100, %cst_75 [2] : vector<1x32x1xf32> to vector<1x32xf32>
    %cst_76 = arith.constant 1.562500e-02 : f32
    %102 = vector.broadcast %cst_76 : f32 to vector<1x32xf32>
    %103 = arith.mulf %101, %102 : vector<1x32xf32>
    %cst_77 = arith.constant 9.99999974E-6 : f32
    %104 = vector.broadcast %cst_77 : f32 to vector<1x32xf32>
    %105 = arith.addf %103, %104 : vector<1x32xf32>
    %106 = math.rsqrt %105 : vector<1x32xf32>
    %107 = vector.shape_cast %106 : vector<1x32xf32> to vector<1x32x1xf32>
    %108 = vector.shape_cast %107 : vector<1x32x1xf32> to vector<1x1x32xf32>
    %109 = vector.broadcast %108 : vector<1x1x32xf32> to vector<8x8x32xf32>
    %110 = arith.mulf %94, %109 : vector<8x8x32xf32>
    %111 = vector.shape_cast %81 : vector<1x32xf32> to vector<1x1x32xf32>
    %112 = vector.broadcast %111 : vector<1x1x32xf32> to vector<8x8x32xf32>
    %113 = arith.mulf %110, %112 : vector<8x8x32xf32>
    %114 = vector.shape_cast %82 : vector<1x32xf32> to vector<1x1x32xf32>
    %115 = vector.broadcast %114 : vector<1x1x32xf32> to vector<8x8x32xf32>
    %116 = arith.addf %113, %115 : vector<8x8x32xf32>
    %117 = arith.negf %116 : vector<8x8x32xf32>
    %118 = math.exp %117 : vector<8x8x32xf32>
    %cst_78 = arith.constant 1.000000e+00 : f32
    %119 = vector.broadcast %cst_78 : f32 to vector<8x8x32xf32>
    %120 = arith.addf %119, %118 : vector<8x8x32xf32>
    %121 = arith.divf %119, %120 : vector<8x8x32xf32>
    %122 = arith.mulf %116, %121 : vector<8x8x32xf32>
    %c1_79 = arith.constant 1 : index
    %c1_80 = arith.constant 1 : index
    %c0_81 = arith.constant 0 : index
    %123 = vector.load %arg12[%c1_79, %c1_80, %c0_81] : memref<10x10x32xf32, #tpu.memory_space<vmem>>, vector<8x8x32xf32>
    tpu.vector_store %arg12[%c1_79, %c1_80, %c0_81], %122 {strides = array<i32>} : memref<10x10x32xf32, #tpu.memory_space<vmem>>, vector<8x8x32xf32>,
    %c0_82 = arith.constant 0 : index
    %c0_83 = arith.constant 0 : index
    %124 = vector.load %arg10[%c0_82, %c0_83] : memref<1x32xf32, #tpu.memory_space<vmem>>, vector<1x32xf32>
    %c0_84 = arith.constant 0 : index
    %c0_85 = arith.constant 0 : index
    %c0_86 = arith.constant 0 : index
    %125 = vector.load %arg12[%c0_84, %c0_85, %c0_86] : memref<10x10x32xf32, #tpu.memory_space<vmem>>, vector<8x8x32xf32>
    %126 = vector.shape_cast %125 : vector<8x8x32xf32> to vector<64x32xf32>
    %c0_87 = arith.constant 0 : index
    %c1_88 = arith.constant 1 : index
    %c0_89 = arith.constant 0 : index
    %127 = vector.load %arg12[%c0_87, %c1_88, %c0_89] : memref<10x10x32xf32, #tpu.memory_space<vmem>>, vector<8x8x32xf32>
    %128 = vector.shape_cast %127 : vector<8x8x32xf32> to vector<64x32xf32>
    %c0_90 = arith.constant 0 : index
    %c2_91 = arith.constant 2 : index
    %c0_92 = arith.constant 0 : index
    %129 = vector.load %arg12[%c0_90, %c2_91, %c0_92] : memref<10x10x32xf32, #tpu.memory_space<vmem>>, vector<8x8x32xf32>
    %130 = vector.shape_cast %129 : vector<8x8x32xf32> to vector<64x32xf32>
    %c1_93 = arith.constant 1 : index
    %c0_94 = arith.constant 0 : index
    %c0_95 = arith.constant 0 : index
    %131 = vector.load %arg12[%c1_93, %c0_94, %c0_95] : memref<10x10x32xf32, #tpu.memory_space<vmem>>, vector<8x8x32xf32>
    %132 = vector.shape_cast %131 : vector<8x8x32xf32> to vector<64x32xf32>
    %c1_96 = arith.constant 1 : index
    %c1_97 = arith.constant 1 : index
    %c0_98 = arith.constant 0 : index
    %133 = vector.load %arg12[%c1_96, %c1_97, %c0_98] : memref<10x10x32xf32, #tpu.memory_space<vmem>>, vector<8x8x32xf32>
    %134 = vector.shape_cast %133 : vector<8x8x32xf32> to vector<64x32xf32>
    %c1_99 = arith.constant 1 : index
    %c2_100 = arith.constant 2 : index
    %c0_101 = arith.constant 0 : index
    %135 = vector.load %arg12[%c1_99, %c2_100, %c0_101] : memref<10x10x32xf32, #tpu.memory_space<vmem>>, vector<8x8x32xf32>
    %136 = vector.shape_cast %135 : vector<8x8x32xf32> to vector<64x32xf32>
    %c2_102 = arith.constant 2 : index
    %c0_103 = arith.constant 0 : index
    %c0_104 = arith.constant 0 : index
    %137 = vector.load %arg12[%c2_102, %c0_103, %c0_104] : memref<10x10x32xf32, #tpu.memory_space<vmem>>, vector<8x8x32xf32>
    %138 = vector.shape_cast %137 : vector<8x8x32xf32> to vector<64x32xf32>
    %c2_105 = arith.constant 2 : index
    %c1_106 = arith.constant 1 : index
    %c0_107 = arith.constant 0 : index
    %139 = vector.load %arg12[%c2_105, %c1_106, %c0_107] : memref<10x10x32xf32, #tpu.memory_space<vmem>>, vector<8x8x32xf32>
    %140 = vector.shape_cast %139 : vector<8x8x32xf32> to vector<64x32xf32>
    %c2_108 = arith.constant 2 : index
    %c2_109 = arith.constant 2 : index
    %c0_110 = arith.constant 0 : index
    %141 = vector.load %arg12[%c2_108, %c2_109, %c0_110] : memref<10x10x32xf32, #tpu.memory_space<vmem>>, vector<8x8x32xf32>
    %142 = vector.shape_cast %141 : vector<8x8x32xf32> to vector<64x32xf32>
    %143 = tpu.concatenate %126, %128, %130, %132, %134, %136, %138, %140, %142 in 1 : vector<64x32xf32>, vector<64x32xf32>, vector<64x32xf32>, vector<64x32xf32>, vector<64x32xf32>, vector<64x32xf32>, vector<64x32xf32>, vector<64x32xf32>, vector<64x32xf32> -> vector<64x288xf32>
    %144 = arith.truncf %143 : vector<64x288xf32> to vector<64x288xbf16>
    %c0_111 = arith.constant 0 : index
    %c0_112 = arith.constant 0 : index
    %145 = vector.load %arg9[%c0_111, %c0_112] : memref<288x32xbf16, #tpu.memory_space<vmem>>, vector<288x32xbf16>
    %cst_113 = arith.constant dense<0.000000e+00> : vector<64x32xf32>
    %146 = tpu.matmul %144, %145, %cst_113 {dimension_numbers = #tpu.dot_dimension_numbers<[1], [0], [0], [1], [0, 0, 1, 1], [], []>} : vector<64x288xbf16>, vector<288x32xbf16>, vector<64x32xf32> -> vector<64x32xf32>
    %147 = vector.broadcast %124 : vector<1x32xf32> to vector<64x32xf32>
    %148 = arith.addf %146, %147 : vector<64x32xf32>
    %149 = vector.shape_cast %148 : vector<64x32xf32> to vector<8x8x32xf32>
    %150 = arith.addf %1, %149 : vector<8x8x32xf32>
    %c0_114 = arith.constant 0 : index
    %c0_115 = arith.constant 0 : index
    %c0_116 = arith.constant 0 : index
    %c0_117 = arith.constant 0 : index
    %151 = vector.load %arg11[%c0_114, %c0_115, %c0_116, %c0_117] : memref<1x8x8x32xf32, #tpu.memory_space<vmem>>, vector<1x8x8x32xf32>
    %152 = vector.shape_cast %151 : vector<1x8x8x32xf32> to vector<8x8x32xf32>
    %153 = vector.shape_cast %150 : vector<8x8x32xf32> to vector<1x8x8x32xf32>
    tpu.vector_store %arg11[%c0_114, %c0_115, %c0_116, %c0_117], %153 {strides = array<i32>} : memref<1x8x8x32xf32, #tpu.memory_space<vmem>>, vector<1x8x8x32xf32>,
    return
  }
  func.func @transform_0(%arg0: i32) -> (i32, i32, i32, i32) {
    %c0_i32 = arith.constant 0 : i32
    %c0_i32_0 = arith.constant 0 : i32
    %c0_i32_1 = arith.constant 0 : i32
    %c0_i32_2 = arith.constant 0 : i32
    return %arg0, %c0_i32, %c0_i32_0, %c0_i32_1 : i32, i32, i32, i32
  }
  func.func @transform_1(%arg0: i32) -> (i32, i32, i32) {
    %c0_i32 = arith.constant 0 : i32
    %c0_i32_0 = arith.constant 0 : i32
    %c0_i32_1 = arith.constant 0 : i32
    return %arg0, %c0_i32, %c0_i32_0 : i32, i32, i32
  }
  func.func @transform_2(%arg0: i32) -> (i32, i32) {
    %c0_i32 = arith.constant 0 : i32
    %c0_i32_0 = arith.constant 0 : i32
    %c0_i32_1 = arith.constant 0 : i32
    return %c0_i32, %c0_i32_0 : i32, i32
  }
  func.func @transform_3(%arg0: i32) -> (i32, i32) {
    %c0_i32 = arith.constant 0 : i32
    %c0_i32_0 = arith.constant 0 : i32
    %c0_i32_1 = arith.constant 0 : i32
    return %c0_i32, %c0_i32_0 : i32, i32
  }
  func.func @transform_4(%arg0: i32) -> (i32, i32) {
    %c0_i32 = arith.constant 0 : i32
    %c0_i32_0 = arith.constant 0 : i32
    %c0_i32_1 = arith.constant 0 : i32
    return %c0_i32, %c0_i32_0 : i32, i32
  }
  func.func @transform_5(%arg0: i32) -> (i32, i32) {
    %c0_i32 = arith.constant 0 : i32
    %c0_i32_0 = arith.constant 0 : i32
    %c0_i32_1 = arith.constant 0 : i32
    return %c0_i32, %c0_i32_0 : i32, i32
  }
  func.func @transform_6(%arg0: i32) -> (i32, i32) {
    %c0_i32 = arith.constant 0 : i32
    %c0_i32_0 = arith.constant 0 : i32
    %c0_i32_1 = arith.constant 0 : i32
    return %c0_i32, %c0_i32_0 : i32, i32
  }
  func.func @transform_7(%arg0: i32) -> (i32, i32) {
    %c0_i32 = arith.constant 0 : i32
    %c0_i32_0 = arith.constant 0 : i32
    %c0_i32_1 = arith.constant 0 : i32
    return %c0_i32, %c0_i32_0 : i32, i32
  }
  func.func @transform_8(%arg0: i32) -> (i32, i32) {
    %c0_i32 = arith.constant 0 : i32
    %c0_i32_0 = arith.constant 0 : i32
    %c0_i32_1 = arith.constant 0 : i32
    return %c0_i32, %c0_i32_0 : i32, i32
  }
  func.func @transform_9(%arg0: i32) -> (i32, i32) {
    %c0_i32 = arith.constant 0 : i32
    %c0_i32_0 = arith.constant 0 : i32
    %c0_i32_1 = arith.constant 0 : i32
    return %c0_i32, %c0_i32_0 : i32, i32
  }
  func.func @transform_10(%arg0: i32) -> (i32, i32, i32, i32) {
    %c0_i32 = arith.constant 0 : i32
    %c0_i32_0 = arith.constant 0 : i32
    %c0_i32_1 = arith.constant 0 : i32
    %c0_i32_2 = arith.constant 0 : i32
    return %arg0, %c0_i32, %c0_i32_0, %c0_i32_1 : i32, i32, i32, i32
  }
}

</mosaic_0001>

<bundles_post_ra>
// kernel: tpu_custom_call.1
= control target key start
LH: loop header
LB: loop body
LE: loop exit
PB: predicated region body
PF: predicated region fallthrough
CT: control target
= control target key end

     0   :  { %15 = vsyncpa [#allocation4], 0  ;;  %s3560_s0 = inlined_call_operand.vmem [shape: f32[2,8,8,32], index: 0, kind: input, shape index: {}]   ;;  %s3561_s1 = inlined_call_operand.vmem [shape: f32[2,1,32], index: 1, kind: input, shape index: {}]   ;;  %s3562_s2 = inlined_call_operand.vmem [shape: f32[1,32], index: 2, kind: input, shape index: {}]   ;;  %s3563_s3 = inlined_call_operand.vmem [shape: f32[1,32], index: 3, kind: input, shape index: {}]   ;;  %s3564_s4 = inlined_call_operand.vmem [shape: bf16[288,32], index: 4, kind: input, shape index: {}]   ;;  %s3565_s5 = inlined_call_operand.vmem [shape: f32[1,32], index: 5, kind: input, shape index: {}]   ;;  %s3566_s6 = inlined_call_operand.vmem [shape: f32[1,32], index: 6, kind: input, shape index: {}]   ;;  %s3567_s7 = inlined_call_operand.vmem [shape: f32[1,32], index: 7, kind: input, shape index: {}]   ;;  %s3568_s8 = inlined_call_operand.vmem [shape: bf16[288,32], index: 8, kind: input, shape index: {}]   ;;  %s3569_s9 = inlined_call_operand.vmem [shape: f32[1,32], index: 9, kind: input, shape index: {}]   ;;  %s3570_s10 = inlined_call_operand.hbm [shape: f32[2,8,8,32], index: 10, kind: output, shape index: {}]  }
   0x1   :  { %17 = vsyncpa [#allocation4 + $0x1], 0  ;;  %s2819_s13 = smov 0   ;;  %s2821_s14 = smov 0  }
   0x2   :  { %s2823_s15 = smov 0   ;;  %s2825_s16 = smov 0  }
   0x3 LB: > { %s2840_s17 = sadd.s32 4294967295, %s2755_s16   ;;  %s2099_s18 = sadd.s32 4294967294, %s2755_s16   ;;  %s2755_s16 = sphi %s2825_s16, %s3582_s16   ;;  %s2751_s15 = sphi %s2823_s15, %s3581_s15   ;;  %s2747_s14 = sphi %s2821_s14, %s3580_s14   ;;  %s2743_s13 = sphi %s2819_s13, %s3579_s13  }
   0x4   : > { %s2844_s19 = sadd.s32 1, %s2755_s16   ;;  %s250_s20 = sadd.s32 1, %s2751_s15 }
   0x5   : > { %s247_s21 = ssub.s32 %s2755_s16, %s2844_s19  ;;  %p260_p0 = scmp.ne.s32.totalorder %s2751_s15, %s2747_s14 }
   0x6   : > { %p248_p1 = scmp.eq.s32.totalorder %s247_s21, 0  ;;  %p261_p2 = scmp.eq.s32.totalorder %s2840_s17, 1 }
   0x7   : > { %p266_p3 = scmp.ne.s32.totalorder %s2747_s14, %s2743_s13  ;;  %p267_p4 = scmp.eq.s32.totalorder %s2099_s18, 1 }
   0x8   : > { %s2855_s22 = scalar_select %p248_p1, %s2751_s15, %s250_s20  }
   0x9   : > { %p2857_p5 = por %p261_p2, %p260_p0  ;;  %p2861_p6 = por %p267_p4, %p266_p3 }
   0xa   : > { %p2102_p7 = scmp.ge.s32.totalorder %s2755_s16, 1  ;;  %p323_p8 = scmp.lt.s32.totalorder %s2755_s16, 3 }
   0xc   : > { %p324_p9 = pnand %p2102_p7, %p323_p8 }
   0xd   : > { %p364_p10 = scmp.lt.s32.totalorder (!%p324_p9), %s2840_s17, 1  ;;  %vm381_vm0 = vcmask (!%p324_p9), 261120   ;;  %vm388_vm1 = vcmask (!%p324_p9), 253952   ;;  %v2757_v0 = vmov (!%p324_p9), 0.0   ;;  %vm383_vm2 = vcmask (!%p324_p9), 254976   ;;  %v2581_v55 = vld [vmem:[%s3564_s4 + $0x40] sm:$0xff] (!%p324_p9)  }
   0xe   : > { %327 = sbr.rel (%p324_p9) target bundleno = 1050 (0x41a), region = 60  ;;  %391 = vst.msk [vmem:[#allocation2 + $0x20] sm:$0x1] (!%p324_p9), %vm388_vm1, %v2757_v0  ;;  %392 = vst.msk [vmem:[#allocation2 + $0x30] sm:$0x1] (!%p324_p9), %vm388_vm1, %v2757_v0  ;;  %v2582_v56 = vld [vmem:[%s3564_s4] sm:$0xff] (!%p324_p9)   ;;  %2180 = vmatprep.subr.bf16.mxu0 (!%p324_p9), %v2581_v55 }
   0xf   : > { %382 = vst.msk [vmem:[#allocation2] sm:$0xff] (!%p324_p9), %vm381_vm0, %v2757_v0  ;;  %386 = vst.msk [vmem:[#allocation2 + $0x90] sm:$0xff] (!%p324_p9), %vm381_vm0, %v2757_v0  ;;  %v2583_v57 = vld [vmem:[%s3564_s4 + $0x48] sm:$0xff] (!%p324_p9)   ;;  %2181 = vmatpush3.bf16.msra.mxu0 (!%p324_p9), %v2582_v56  ;;  %s3571_s21 = smov (!%p324_p9), 64   ;;  %s3573_s27 = smov (!%p324_p9), 96   ;;  %vm852_vm3 = vcmask (!%p324_p9), 523264  }
  0x10   : > { %390 = vst.msk [vmem:[#allocation2 + $0x10] sm:$0x1] (!%p324_p9), %vm388_vm1, %v2757_v0  ;;  %393 = vst.msk [vmem:[#allocation2 + $0x40] sm:$0x1] (!%p324_p9), %vm388_vm1, %v2757_v0  ;;  %v2584_v62 = vld [vmem:[%s3564_s4 + $0x8] sm:$0xff] (!%p324_p9)   ;;  %2182 = vmatprep.subr.bf16.mxu0 (!%p324_p9), %v2583_v57  ;;  %vm861_vm4 = vcmask (!%p324_p9), 785408  }
  0x11   : > { %394 = vst.msk [vmem:[#allocation2 + $0x50] sm:$0x1] (!%p324_p9), %vm388_vm1, %v2757_v0  ;;  %395 = vst.msk [vmem:[#allocation2 + $0x60] sm:$0x1] (!%p324_p9), %vm388_vm1, %v2757_v0  ;;  %s3578_s28 = smov (!%p324_p9), 96   ;;  %s2179_s12 = sshll.u32 (!%p324_p9), %s2840_s17, 10 }
  0x12   : > { %396 = vst.msk [vmem:[#allocation2 + $0x70] sm:$0x1] (!%p324_p9), %vm388_vm1, %v2757_v0  ;;  %397 = vst.msk [vmem:[#allocation2 + $0x80] sm:$0x1] (!%p324_p9), %vm388_vm1, %v2757_v0  ;;  %s2761_s30 = smov (!%p324_p9), [#allocation3]  }
  0x13   : > { %400 = vst.msk [vmem:[#allocation2 + $0x19] sm:$0x1] (!%p324_p9), %vm388_vm1, %v2757_v0  ;;  %401 = vst.msk [vmem:[#allocation2 + $0x29] sm:$0x1] (!%p324_p9), %vm388_vm1, %v2757_v0  ;;  %2183 = vmatpush3.bf16.msra.mxu0 (!%p324_p9), %v2584_v62 }
  0x14   : > { %402 = vst.msk [vmem:[#allocation2 + $0x39] sm:$0x1] (!%p324_p9), %vm388_vm1, %v2757_v0  ;;  %403 = vst.msk [vmem:[#allocation2 + $0x49] sm:$0x1] (!%p324_p9), %vm388_vm1, %v2757_v0 }
  0x15   : > { %404 = vst.msk [vmem:[#allocation2 + $0x59] sm:$0x1] %vm388_vm1, %v2757_v0  ;;  %405 = vst.msk [vmem:[#allocation2 + $0x69] sm:$0x1] %vm388_vm1, %v2757_v0  ;;  %s2889_s25 = scalar_select %p364_p10, %s2840_s17, 1 }
  0x16   : > { %406 = vst.msk [vmem:[#allocation2 + $0x79] sm:$0x1] %vm388_vm1, %v2757_v0  ;;  %407 = vst.msk [vmem:[#allocation2 + $0x89] sm:$0x1] %vm388_vm1, %v2757_v0 }
  0x17   : > { %389 = vst.msk [vmem:[#allocation2] sm:$0x1] %vm388_vm1, %v2757_v0  ;;  %398 = vst.msk [vmem:[#allocation2 + $0x90] sm:$0x1] %vm388_vm1, %v2757_v0  ;;  %s2178_s26 = sshll.u32 %s2889_s25, 6  ;;  %s371_s18 = scalar_lea.vmem %s3561_s1, %s2889_s25 }
  0x18   : > { %384 = vst.msk [vmem:[#allocation2 + $0x8] sm:$0x3] %vm383_vm2, %v2757_v0  ;;  %387 = vst.msk [vmem:[#allocation2 + $0x98] sm:$0x3] %vm383_vm2, %v2757_v0  ;;  %s2899_s29 = scalar_lea.vmem %s3560_s0, %s2178_s26  ;;  %s2759_s26 = smov 32  }
  0x19   : > { %399 = vst.msk [vmem:[#allocation2 + $0x9] sm:$0x1] %vm388_vm1, %v2757_v0  ;;  %408 = vst.msk [vmem:[#allocation2 + $0x99] sm:$0x1] %vm388_vm1, %v2757_v0  ;;  %v373_v1 = vld [vmem:[%s2899_s29] sm:$0xff]  ;;  %v374_v2 = vld [vmem:[%s2899_s29 + $0x8] sm:$0xff] }
  0x1a   : > { %v375_v3 = vld [vmem:[%s2899_s29 + $0x10] sm:$0xff]  ;;  %v376_v4 = vld [vmem:[%s2899_s29 + $0x18] sm:$0xff]  ;;  %v377_v5 = vld [vmem:[%s2899_s29 + $0x20] sm:$0xff]  ;;  %v411_v7 = vsel %vm381_vm0, %v373_v1, 0.0  ;;  %v412_v8 = vsel %vm381_vm0, %v374_v2, 0.0 }
  0x1b   : > { %v378_v6 = vld [vmem:[%s2899_s29 + $0x28] sm:$0xff]  ;;  %v414_v9 = vsel %vm381_vm0, %v375_v3, 0.0  ;;  %v379_v10 = vld [vmem:[%s2899_s29 + $0x30] sm:$0xff]  ;;  %v380_v11 = vld [vmem:[%s2899_s29 + $0x38] sm:$0xff]  ;;  %v413_v12 = vadd.f32 %v412_v8, %v411_v7  ;;  %v416_v13 = vsel %vm381_vm0, %v376_v4, 0.0  ;;  %v418_v14 = vsel %vm381_vm0, %v377_v5, 0.0 }
  0x1c   : > { %v420_v15 = vsel %vm381_vm0, %v378_v6, 0.0  ;;  %v422_v17 = vsel %vm381_vm0, %v379_v10, 0.0  ;;  %v424_v18 = vsel %vm381_vm0, %v380_v11, 0.0  ;;  %v2585_v0 = vld [vmem:[%s3564_s4 + $0x50] sm:$0xff]   ;;  %v2588_v8 = vld [vmem:[%s3564_s4 + $0x18] sm:$0xff]  }
  0x1d   : > { %v415_v16 = vadd.f32 %v414_v9, %v413_v12  ;;  %2184 = vmatprep.subr.bf16.mxu0 %v2585_v0  ;;  %v2589_v9 = vld [vmem:[%s3564_s4 + $0x60] sm:$0xff]  }
  0x1e   : > { %v2590_v12 = vld [vmem:[%s3564_s4 + $0x20] sm:$0xff]  }
  0x1f   : > { %v417_v19 = vadd.f32 %v416_v13, %v415_v16 }
  0x21   : > { %v419_v20 = vadd.f32 %v418_v14, %v417_v19  ;;  %v2106_v19 = vld [vmem:[%s3562_s2] ss:$0 sm:$0xff] }
  0x23   : > { %v421_v21 = vadd.f32 %v420_v15, %v419_v20 }
  0x25   : > { %v423_v22 = vadd.f32 %v422_v17, %v421_v21 }
  0x27   : > { %v425_v23 = vadd.f32 %v424_v18, %v423_v22 }
  0x29   : > { %v426_v24 = vsel %vm381_vm0, %v425_v23, 0.0 }
  0x2a   : > { %v427_v25 = vrot.slane %v426_v24, 4 }
  0x2c   : > { %v428_v26 = vadd.f32 %v427_v25, %v426_v24  ;;  %v2107_v24 = vld [vmem:[%s3563_s3] ss:$0 sm:$0xff] }
  0x2e   : > { %v429_v27 = vrot.slane %v428_v26, 2 }
  0x30   : > { %v430_v28 = vadd.f32 %v429_v27, %v428_v26 }
  0x32   : > { %v431_v29 = vrot.slane %v430_v28, 1 }
  0x34   : > { %v432_v30 = vadd.f32 %v431_v29, %v430_v28 }
  0x36   : > { %v434_v31 = vmul.f32 0.015625, %v432_v30 }
  0x38   : > { %v2918_v32 = vsub.f32 %v373_v1, %v434_v31  ;;  %v436_v33 = vsub.f32 %v374_v2, %v434_v31  ;;  %v437_v34 = vsub.f32 %v375_v3, %v434_v31  ;;  %v2920_v35 = vsub.f32 %v376_v4, %v434_v31  ;;  %v2586_v3 = vld [vmem:[%s3564_s4 + $0x10] sm:$0xff]  }
  0x39   : > { %v2922_v36 = vsub.f32 %v377_v5, %v434_v31  ;;  %v2924_v37 = vsub.f32 %v378_v6, %v434_v31  ;;  %v441_v42 = vsub.f32 %v379_v10, %v434_v31  ;;  %v442_v48 = vsub.f32 %v380_v11, %v434_v31  ;;  %v2587_v5 = vld [vmem:[%s3564_s4 + $0x58] sm:$0xff]   ;;  %2185 = vmatpush3.bf16.msra.mxu0 %v2586_v3 }
  0x3a   : > { %v443_v38 = vmul.f32 %v2918_v32, %v2918_v32  ;;  %v444_v39 = vmul.f32 %v436_v33, %v436_v33  ;;  %v445_v40 = vmul.f32 %v437_v34, %v437_v34  ;;  %v446_v41 = vmul.f32 %v2920_v35, %v2920_v35  ;;  %2186 = vmatprep.subr.bf16.mxu0 %v2587_v5 }
  0x3b   : > { %v447_v43 = vmul.f32 %v2922_v36, %v2922_v36  ;;  %v448_v49 = vmul.f32 %v2924_v37, %v2924_v37  ;;  %v449_v52 = vmul.f32 %v441_v42, %v441_v42  ;;  %v450_v58 = vmul.f32 %v442_v48, %v442_v48 }
  0x3c   : > { %v451_v44 = vsel %vm381_vm0, %v443_v38, 0.0  ;;  %v452_v45 = vsel %vm381_vm0, %v444_v39, 0.0  ;;  %v454_v46 = vsel %vm381_vm0, %v445_v40, 0.0  ;;  %v456_v50 = vsel %vm381_vm0, %v446_v41, 0.0 }
  0x3d   : > { %v453_v47 = vadd.f32 %v452_v45, %v451_v44  ;;  %v458_v53 = vsel %vm381_vm0, %v447_v43, 0.0  ;;  %v460_v59 = vsel %vm381_vm0, %v448_v49, 0.0  ;;  %v462_v61 = vsel %vm381_vm0, %v449_v52, 0.0  ;;  %2187 = vmatpush3.bf16.msra.mxu0 %v2588_v8 }
  0x3e   : > { %v464_v1 = vsel %vm381_vm0, %v450_v58, 0.0  ;;  %2188 = vmatprep.subr.bf16.mxu0 %v2589_v9 }
  0x3f   : > { %v455_v51 = vadd.f32 %v454_v46, %v453_v47 }
  0x41   : > { %v457_v54 = vadd.f32 %v456_v50, %v455_v51  ;;  %2189 = vmatpush3.bf16.msra.mxu0 %v2590_v12 }
  0x43   : > { %v459_v60 = vadd.f32 %v458_v53, %v457_v54 }
  0x45   : > { %v461_v63 = vadd.f32 %v460_v59, %v459_v60 }
  0x47   : > { %v463_v2 = vadd.f32 %v462_v61, %v461_v63 }
  0x49   : > { %v465_v4 = vadd.f32 %v464_v1, %v463_v2 }
  0x4b   : > { %v466_v6 = vsel %vm381_vm0, %v465_v4, 0.0 }
  0x4c   : > { %v467_v7 = vrot.slane %v466_v6, 4 }
  0x4e   : > { %v468_v10 = vadd.f32 %v467_v7, %v466_v6 }
  0x50   : > { %v469_v11 = vrot.slane %v468_v10, 2 }
  0x52   : > { %v470_v13 = vadd.f32 %v469_v11, %v468_v10  ;;  %v2591_v10 = vld [vmem:[%s3564_s4 + $0x68] sm:$0xff]  }
  0x53   : > { %v2592_v11 = vld [vmem:[%s3564_s4 + $0x28] sm:$0xff]   ;;  %2190 = vmatprep.subr.bf16.mxu0 %v2591_v10 }
  0x54   : > { %v471_v14 = vrot.slane %v470_v13, 1  ;;  %2191 = vmatpush3.bf16.msra.mxu0 %v2592_v11 }
  0x56   : > { %v472_v15 = vadd.f32 %v471_v14, %v470_v13 }
  0x58   : > { %v474_v16 = vmul.f32 0.015625, %v472_v15 }
  0x5a   : > { %v475_v17 = vadd.f32 1e-05, %v474_v16 }
  0x5c   : > { %2617 = vrsqrt.f32 %v475_v17 }
  0x66   : > { %v2618_v18 = vpop.eup %2617 }
  0x67   : > { %v478_v20 = vmul.f32 %v2618_v18, %v436_v33  ;;  %v479_v21 = vmul.f32 %v2618_v18, %v437_v34  ;;  %v477_v22 = vmul.f32 %v2618_v18, %v2918_v32  ;;  %v480_v23 = vmul.f32 %v2618_v18, %v2920_v35 }
  0x68   : > { %v481_v25 = vmul.f32 %v2618_v18, %v2922_v36  ;;  %v482_v26 = vmul.f32 %v2618_v18, %v2924_v37  ;;  %v483_v27 = vmul.f32 %v2618_v18, %v441_v42  ;;  %v484_v28 = vmul.f32 %v2618_v18, %v442_v48 }
  0x69   : > { %v492_v29 = vmul.f32 %v2106_v19, %v478_v20  ;;  %v493_v30 = vmul.f32 %v2106_v19, %v479_v21  ;;  %v491_v31 = vmul.f32 %v2106_v19, %v477_v22  ;;  %v494_v38 = vmul.f32 %v2106_v19, %v480_v23  ;;  %v2593_v20 = vld [vmem:[%s3564_s4 + $0x70] sm:$0xff]  }
  0x6a   : > { %v495_v33 = vmul.f32 %v2106_v19, %v481_v25  ;;  %v496_v34 = vmul.f32 %v2106_v19, %v482_v26  ;;  %v497_v39 = vmul.f32 %v2106_v19, %v483_v27  ;;  %v498_v32 = vmul.f32 %v2106_v19, %v484_v28  ;;  %v2594_v23 = vld [vmem:[%s3564_s4 + $0x30] sm:$0xff]   ;;  %2192 = vmatprep.subr.bf16.mxu0 %v2593_v20  ;;  %v595_v28 = vld [vmem:[#allocation2 + $0x2] sm:$0xff] }
  0x6b   : > { %v506_v40 = vadd.f32 %v2107_v24, %v492_v29  ;;  %v507_v35 = vadd.f32 %v2107_v24, %v493_v30  ;;  %v505_v41 = vadd.f32 %v2107_v24, %v491_v31  ;;  %v508_v43 = vadd.f32 %v2107_v24, %v494_v38  ;;  %2193 = vmatpush3.bf16.msra.mxu0 %v2594_v23  ;;  %v587_v31 = vld [vmem:[#allocation2 + $0x1] sm:$0xff] }
  0x6c   : > { %v509_v44 = vadd.f32 %v2107_v24, %v495_v33  ;;  %v2983_v45 = vadd.f32 %v2107_v24, %v496_v34  ;;  %v2985_v42 = vadd.f32 %v2107_v24, %v497_v39  ;;  %v2987_v48 = vadd.f32 %v2107_v24, %v498_v32 }
  0x6d   : > { %v2109_v36 = vmul.f32 -1.442695, %v506_v40  ;;  %v2110_v46 = vmul.f32 -1.442695, %v507_v35  ;;  %v2108_v37 = vmul.f32 -1.442695, %v505_v41 }
  0x6e   : > { %v2111_v47 = vmul.f32 -1.442695, %v508_v43  ;;  %v2112_v49 = vmul.f32 -1.442695, %v509_v44  ;;  %v2113_v50 = vmul.f32 -1.442695, %v2983_v45 }
  0x6f   : > { %2619 = vpow2.f32 %v2109_v36  ;;  %v2114_v51 = vmul.f32 -1.442695, %v2985_v42  ;;  %v2115_v52 = vmul.f32 -1.442695, %v2987_v48  ;;  %v2596_v36 = vld [vmem:[%s3564_s4 + $0x80] sm:$0xff]  }
  0x70   : > { %2621 = vpow2.f32 %v2110_v46  ;;  %v2597_v46 = vld [vmem:[%s3564_s4 + $0x38] sm:$0xff]   ;;  %2272 = vmatprep.subr.bf16.mxu1 %v2596_v36 }
  0x71   : > { %2623 = vpow2.f32 %v2108_v37  ;;  %2273 = vmatpush3.bf16.msra.mxu1 %v2596_v36 }
  0x72   : > { %2625 = vpow2.f32 %v2111_v47 }
  0x73   : > { %2627 = vpow2.f32 %v2112_v49 }
  0x74   : > { %2629 = vpow2.f32 %v2113_v50 }
  0x75   : > { %2631 = vpow2.f32 %v2114_v51 }
  0x76   : > { %2633 = vpow2.f32 %v2115_v52 }
  0x79   : > { %v2620_v53 = vpop.eup %2619 }
  0x7a   : > { %v2622_v54 = vpop.eup %2621  ;;  %v538_v55 = vadd.f32 1.0, %v2620_v53 }
  0x7b   : > { %v2624_v56 = vpop.eup %2623  ;;  %v539_v57 = vadd.f32 1.0, %v2622_v54 }
  0x7c   : > { %v2626_v58 = vpop.eup %2625  ;;  %2635 = vrcp.f32 %v538_v55  ;;  %v537_v59 = vadd.f32 1.0, %v2624_v56 }
  0x7d   : > { %v2628_v60 = vpop.eup %2627  ;;  %2637 = vrcp.f32 %v539_v57  ;;  %v540_v61 = vadd.f32 1.0, %v2626_v58 }
  0x7e   : > { %v2630_v62 = vpop.eup %2629  ;;  %2639 = vrcp.f32 %v537_v59  ;;  %v541_v63 = vadd.f32 1.0, %v2628_v60 }
  0x7f   : > { %v2632_v0 = vpop.eup %2631  ;;  %2641 = vrcp.f32 %v540_v61  ;;  %v542_v1 = vadd.f32 1.0, %v2630_v62 }
  0x80   : > { %v2634_v2 = vpop.eup %2633  ;;  %2643 = vrcp.f32 %v541_v63  ;;  %v543_v3 = vadd.f32 1.0, %v2632_v0 }
  0x81   : > { %2645 = vrcp.f32 %v542_v1  ;;  %v544_v4 = vadd.f32 1.0, %v2634_v2 }
  0x82   : > { %2647 = vrcp.f32 %v543_v3 }
  0x83   : > { %2649 = vrcp.f32 %v544_v4 }
  0x86   : > { %v2636_v5 = vpop.eup %2635 }
  0x87   : > { %v2638_v6 = vpop.eup %2637  ;;  %v562_v7 = vmul.f32 %v2636_v5, %v506_v40 }
  0x88   : > { %v2640_v8 = vpop.eup %2639  ;;  %v563_v9 = vmul.f32 %v2638_v6, %v507_v35  ;;  %v3086_v6 = vld [vmem:[#allocation2 + $0x92] sm:$0xff] }
  0x89   : > { %v2642_v12 = vpop.eup %2641  ;;  %571 = vst.msk [vmem:[#allocation2 + $0x21] sm:$0xff] %vm381_vm0, %v562_v7  ;;  %v561_v13 = vmul.f32 %v2640_v8, %v505_v41 }
  0x8a   : > { %v2644_v14 = vpop.eup %2643  ;;  %572 = vst.msk [vmem:[#allocation2 + $0x31] sm:$0xff] %vm381_vm0, %v563_v9  ;;  %v564_v15 = vmul.f32 %v2642_v12, %v508_v43  ;;  %v635_v12 = vld [vmem:[#allocation2 + $0x90] sm:$0xff] }
  0x8b   : > { %v2646_v16 = vpop.eup %2645  ;;  %570 = vst.msk [vmem:[#allocation2 + $0x11] sm:$0xff] %vm381_vm0, %v561_v13  ;;  %v565_v17 = vmul.f32 %v2644_v14, %v509_v44 }
  0x8c   : > { %v2648_v18 = vpop.eup %2647  ;;  %573 = vst.msk [vmem:[#allocation2 + $0x41] sm:$0xff] %vm381_vm0, %v564_v15  ;;  %v566_v19 = vmul.f32 %v2646_v16, %v2983_v45  ;;  %v2595_v45 = vld [vmem:[%s3564_s4 + $0x78] sm:$0xff]  }
  0x8d   : > { %v2650_v21 = vpop.eup %2649  ;;  %574 = vst.msk [vmem:[#allocation2 + $0x51] sm:$0xff] %vm381_vm0, %v565_v17  ;;  %v567_v22 = vmul.f32 %v2648_v18, %v2985_v42  ;;  %v2598_v42 = vld [vmem:[%s3564_s4 + $0x88] sm:$0xff]   ;;  %2194 = vmatprep.subr.bf16.mxu0 %v2595_v45  ;;  %v643_v16 = vld [vmem:[#allocation2 + $0x91] sm:$0xff] }
  0x8e   : > { %575 = vst.msk [vmem:[#allocation2 + $0x61] sm:$0xff] %vm381_vm0, %v566_v19  ;;  %v568_v24 = vmul.f32 %v2650_v21, %v2987_v48  ;;  %2195 = vmatpush3.bf16.msra.mxu0 %v2597_v46  ;;  %2274 = vmatprep.subr.bf16.mxu1 %v2598_v42 }
  0x8f   : > { %576 = vst.msk [vmem:[#allocation2 + $0x71] sm:$0xff] %vm381_vm0, %v567_v22  ;;  %2275 = vmatpush3.bf16.msra.mxu1 %v2598_v42 }
  0x90   : > { %v3014_v25 = vld [vmem:[#allocation2 + $0x20] sm:$0xff]  ;;  %577 = vst.msk [vmem:[#allocation2 + $0x81] sm:$0xff] %vm381_vm0, %v568_v24 }
  0x91   : > { %v620_v26 = vld [vmem:[#allocation2 + $0x22] sm:$0xff]  ;;  %v3017_v27 = vld [vmem:[#allocation2 + $0x30] sm:$0xff] }
  0x92   : > { %v2351_v29 = vpack.i.bf16 %v3017_v27, %v3014_v25  ;;  %v619_v30 = vld [vmem:[#allocation2 + $0x12] sm:$0xff]  ;;  %v3028_v40 = vld [vmem:[#allocation2 + $0x21] sm:$0xff] }
  0x93   : > { %v3021_v38 = vld [vmem:[#allocation2 + $0x11] sm:$0xff]  ;;  %v2341_v33 = vpack.i.bf16 %v620_v26, %v619_v30  ;;  %v2356_v34 = vpack.i.bf16 %v619_v30, %v595_v28  ;;  %v622_v47 = vld [vmem:[#allocation2 + $0x42] sm:$0xff] }
  0x94   : > { %2352 = vrot.lane.b32.xlu1 %v2351_v29, %s3571_s21  ;;  %v2346_v39 = vpack.i.bf16 %v3021_v38, %v587_v31  ;;  %v3026_v32 = vld [vmem:[#allocation2 + $0x10] sm:$0xff]  ;;  %v3053_v50 = vld [vmem:[#allocation2 + $0x40] sm:$0xff] }
  0x95   : > { %2342 = vrot.lane.b32.xlu0 %v2341_v33, %s2759_s26  ;;  %v3030_v35 = vld [vmem:[#allocation2 + $0x31] sm:$0xff]  ;;  %v2366_v44 = vpack.i.bf16 %v3014_v25, %v3026_v32  ;;  %v3061_v55 = vld [vmem:[#allocation2 + $0x41] sm:$0xff]  ;;  %v2396_v57 = vpack.i.bf16 %v3053_v50, %v3017_v27 }
  0x96   : > { %v621_v41 = vld [vmem:[#allocation2 + $0x32] sm:$0xff]  ;;  %v2361_v37 = vpack.i.bf16 %v3030_v35, %v3028_v40  ;;  %v624_v59 = vld [vmem:[#allocation2 + $0x62] sm:$0xff] }
  0x97   : > { %v896_v43 = vpack.c.bf16 %v621_v41, %v620_v26  ;;  %v2371_v48 = vpack.i.bf16 %v622_v47, %v621_v41  ;;  %v623_v49 = vld [vmem:[#allocation2 + $0x52] sm:$0xff]  ;;  %v2386_v53 = vpack.i.bf16 %v621_v41, %v620_v26  ;;  %v3074_v61 = vld [vmem:[#allocation2 + $0x60] sm:$0xff] }
  0x98   : > { %2357 = vrot.lane.b32.xlu1 %v2356_v34, %s3571_s21  ;;  %v3055_v51 = vld [vmem:[#allocation2 + $0x50] sm:$0xff]  ;;  %v899_v52 = vpack.c.bf16 %v623_v49, %v622_v47  ;;  %s3577_s21 = smov 64   ;;  %v2401_v60 = vpack.i.bf16 %v624_v59, %v623_v49  ;;  %v2416_v63 = vpack.i.bf16 %v623_v49, %v622_v47  ;;  %v3082_v1 = vld [vmem:[#allocation2 + $0x61] sm:$0xff] }
  0x99   : > { %2347 = vrot.lane.b32.xlu0 %v2346_v39, %s2759_s26  ;;  %2276 = vmatprep.mubr.msk.bf16.mxu1 %vm381_vm0, %v896_v43  ;;  %v2381_v54 = vpack.i.bf16 %v3055_v51, %v3053_v50  ;;  %v3063_v56 = vld [vmem:[#allocation2 + $0x51] sm:$0xff]  ;;  %v626_v4 = vld [vmem:[#allocation2 + $0x82] sm:$0xff]  ;;  %v2426_v7 = vpack.i.bf16 %v3074_v61, %v3055_v51 }
  0x9a   : > { %2277 = vmatmul.mubr.msk.bf16.vlgmr.msra.gmra.mrb[0].mxu1 %vm381_vm0, %v899_v52  ;;  %v2391_v58 = vpack.i.bf16 %v3063_v56, %v3061_v55  ;;  %v3076_v62 = vld [vmem:[#allocation2 + $0x70] sm:$0xff]  ;;  %v905_v8 = vpack.c.bf16 %v3086_v6, %v626_v4  ;;  %v634_v11 = vld [vmem:[#allocation2 + $0x80] sm:$0xff] }
  0x9b   : > { %v2411_v0 = vpack.i.bf16 %v3076_v62, %v3074_v61  ;;  %v3084_v2 = vld [vmem:[#allocation2 + $0x71] sm:$0xff]  ;;  %v2441_v14 = vpack.i.bf16 %v635_v12, %v634_v11  ;;  %v3101_v15 = vld [vmem:[#allocation2 + $0x81] sm:$0xff]  ;;  %v2456_v17 = vpack.i.bf16 %v634_v11, %v3076_v62 }
  0x9c   : > { %2367 = vrot.lane.b32.xlu1 %v2366_v44, %s3573_s27  ;;  %v625_v3 = vld [vmem:[#allocation2 + $0x72] sm:$0xff]  ;;  %v2421_v9 = vpack.i.bf16 %v3084_v2, %v3082_v1  ;;  %v2451_v18 = vpack.i.bf16 %v643_v16, %v3101_v15  ;;  %v579_v24 = vld [vmem:[#allocation2] sm:$0xff] }
  0x9d   : > { %2362 = vrot.lane.b32.xlu0 %v2361_v37, %s3573_s27  ;;  %v902_v5 = vpack.c.bf16 %v625_v3, %v624_v59  ;;  %v2431_v10 = vpack.i.bf16 %v626_v4, %v625_v3  ;;  %v2446_v13 = vpack.i.bf16 %v625_v3, %v624_v59 }
  0x9f   : > { %2280 = vmatprep.mubr.msk.bf16.mxu1 %vm381_vm0, %v902_v5 }
  0xa0   : > { %2377 = vrot.lane.b32.xlu1 %v2361_v37, %s2759_s26 }
  0xa1   : > { %2372 = vrot.lane.b32.xlu0 %v2371_v48, %s2759_s26 }
  0xa2   : > { %2281 = vmatmul.mubr.msk.bf16.gmra.mrb[4].mxu1 %vm381_vm0, %v905_v8 }
  0xa4   : > { %2387 = vrot.lane.b32.xlu1 %v2386_v53, %s3577_s21 }
  0xa5   : > { %2382 = vrot.lane.b32.xlu0 %v2381_v54, %s3577_s21 }
  0xa8   : > { %2397 = vrot.lane.b32.xlu1 %v2396_v57, %s3573_s27 }
  0xa9   : > { %2392 = vrot.lane.b32.xlu0 %v2391_v58, %s3573_s27 }
  0xac   : > { %2407 = vrot.lane.b32.xlu1 %v2391_v58, %s2759_s26 }
  0xad   : > { %2402 = vrot.lane.b32.xlu0 %v2401_v60, %s2759_s26 }
  0xb0   : > { %2417 = vrot.lane.b32.xlu1 %v2416_v63, %s3577_s21 }
  0xb1   : > { %2412 = vrot.lane.b32.xlu0 %v2411_v0, %s3577_s21 }
  0xb4   : > { %2427 = vrot.lane.b32.xlu1 %v2426_v7, %s3573_s27 }
  0xb5   : > { %2422 = vrot.lane.b32.xlu0 %v2421_v9, %s3573_s27 }
  0xb8   : > { %2437 = vrot.lane.b32.xlu1 %v2421_v9, %s2759_s26 }
  0xb9   : > { %2432 = vrot.lane.b32.xlu0 %v2431_v10, %s2759_s26 }
  0xbc   : > { %2447 = vrot.lane.b32.xlu1 %v2446_v13, %s3577_s21 }
  0xbd   : > { %2442 = vrot.lane.b32.xlu0 %v2441_v14, %s3577_s21 }
  0xc0   : > { %2457 = vrot.lane.b32.xlu1 %v2456_v17, %s3573_s27 }
  0xc1   : > { %2452 = vrot.lane.b32.xlu0 %v2451_v18, %s3573_s27 }
 0x106   : > { %v2353_v19 = vpop.permute.xlu1 %2352 }
 0x107   : > { %v2343_v20 = vpop.permute.xlu0 %2342  ;;  %v2355_v33 = vunpack.i.h.bf16 %v2353_v19  ;;  %v2354_v34 = vunpack.i.l.bf16 %v2353_v19 }
 0x108   : > { %v2345_v21 = vunpack.i.h.bf16 %v2343_v20  ;;  %v2344_v22 = vunpack.i.l.bf16 %v2343_v20 }
 0x10a   : > { %v2358_v23 = vpop.permute.xlu1 %2357  ;;  %v870_v44 = vsel %vm381_vm0, %v3021_v38, %v2344_v22  ;;  %v871_v45 = vsel %vm381_vm0, %v3028_v40, %v2345_v21 }
 0x10b   : > { %v2348_v26 = vpop.permute.xlu0 %2347  ;;  %v2360_v28 = vunpack.i.h.bf16 %v2358_v23  ;;  %v2359_v29 = vunpack.i.l.bf16 %v2358_v23  ;;  %v878_v52 = vsel %vm852_vm3, %v870_v44, %v2354_v34 }
 0x10c   : > { %v2350_v30 = vunpack.i.h.bf16 %v2348_v26  ;;  %v2349_v31 = vunpack.i.l.bf16 %v2348_v26 }
 0x10e   : > { %v844_v39 = vsel %vm381_vm0, %v579_v24, %v2349_v31  ;;  %v845_v41 = vsel %vm381_vm0, %v3026_v32, %v2350_v30  ;;  %v2368_v43 = vpop.permute.xlu1 %2367  ;;  %v879_v32 = vsel %vm852_vm3, %v871_v45, %v2355_v33 }
 0x10f   : > { %v2370_v36 = vunpack.i.h.bf16 %v2368_v43  ;;  %v2369_v46 = vunpack.i.l.bf16 %v2368_v43  ;;  %v2363_v37 = vpop.permute.xlu0 %2362  ;;  %v853_v48 = vsel %vm852_vm3, %v844_v39, %v2359_v29  ;;  %v854_v49 = vsel %vm852_vm3, %v845_v41, %v2360_v28 }
 0x110   : > { %v2365_v42 = vunpack.i.h.bf16 %v2363_v37  ;;  %v2364_v47 = vunpack.i.l.bf16 %v2363_v37 }
 0x111   : > { %v862_v53 = vsel %vm861_vm4, %v853_v48, %v2369_v46  ;;  %v863_v38 = vsel %vm861_vm4, %v854_v49, %v2370_v36 }
 0x112   : > { %v2378_v54 = vpop.permute.xlu1 %2377  ;;  %v886_v40 = vsel %vm861_vm4, %v878_v52, %v2364_v47  ;;  %v887_v57 = vsel %vm861_vm4, %v879_v32, %v2365_v42  ;;  %v894_v58 = vpack.c.bf16 %v863_v38, %v862_v53 }
 0x113   : > { %v2373_v59 = vpop.permute.xlu0 %2372  ;;  %v895_v60 = vpack.c.bf16 %v887_v57, %v886_v40  ;;  %v2380_v63 = vunpack.i.h.bf16 %v2378_v54  ;;  %v2379_v0 = vunpack.i.l.bf16 %v2378_v54 }
 0x114   : > { %v2375_v4 = vunpack.i.h.bf16 %v2373_v59  ;;  %v2374_v5 = vunpack.i.l.bf16 %v2373_v59 }
 0x115   : > { %1100 = vmatprep.mubr.bf16.mxu0 %v895_v60  ;;  %v847_v12 = vsel %vm381_vm0, %v3017_v27, %v2380_v63  ;;  %v846_v13 = vsel %vm381_vm0, %v3014_v25, %v2379_v0 }
 0x116   : > { %1101 = vmatmul.mubr.bf16.vlgmr.msra.gmra.mrb[0].mxu0 %v894_v58  ;;  %v2388_v3 = vpop.permute.xlu1 %2387  ;;  %v873_v16 = vsel %vm381_vm0, %v3061_v55, %v2375_v4  ;;  %v872_v17 = vsel %vm381_vm0, %v3030_v35, %v2374_v5 }
 0x117   : > { %v2383_v7 = vpop.permute.xlu0 %2382  ;;  %v2390_v8 = vunpack.i.h.bf16 %v2388_v3  ;;  %v2389_v9 = vunpack.i.l.bf16 %v2388_v3 }
 0x118   : > { %v2385_v10 = vunpack.i.h.bf16 %v2383_v7  ;;  %v2384_v11 = vunpack.i.l.bf16 %v2383_v7 }
 0x119   : > { %v855_v21 = vsel %vm852_vm3, %v846_v13, %v2389_v9  ;;  %v856_v22 = vsel %vm852_vm3, %v847_v12, %v2390_v8 }
 0x11a   : > { %v2398_v14 = vpop.permute.xlu1 %2397  ;;  %v880_v27 = vsel %vm852_vm3, %v872_v17, %v2384_v11  ;;  %v881_v25 = vsel %vm852_vm3, %v873_v16, %v2385_v10 }
 0x11b   : > { %v2400_v18 = vunpack.i.h.bf16 %v2398_v14  ;;  %v2399_v19 = vunpack.i.l.bf16 %v2398_v14  ;;  %v2393_v20 = vpop.permute.xlu0 %2392 }
 0x11c   : > { %v2395_v23 = vunpack.i.h.bf16 %v2393_v20  ;;  %v2394_v24 = vunpack.i.l.bf16 %v2393_v20 }
 0x11d   : > { %v864_v26 = vsel %vm861_vm4, %v855_v21, %v2399_v19  ;;  %v865_v55 = vsel %vm861_vm4, %v856_v22, %v2400_v18 }
 0x11e   : > { %v2408_v28 = vpop.permute.xlu1 %2407  ;;  %v888_v35 = vsel %vm861_vm4, %v880_v27, %v2394_v24  ;;  %v889_v29 = vsel %vm861_vm4, %v881_v25, %v2395_v23  ;;  %v897_v30 = vpack.c.bf16 %v865_v55, %v864_v26 }
 0x11f   : > { %v2403_v31 = vpop.permute.xlu0 %2402  ;;  %v898_v33 = vpack.c.bf16 %v889_v29, %v888_v35  ;;  %v2410_v34 = vunpack.i.h.bf16 %v2408_v28  ;;  %v2409_v39 = vunpack.i.l.bf16 %v2408_v28 }
 0x120   : > { %v2405_v43 = vunpack.i.h.bf16 %v2403_v31  ;;  %v2404_v44 = vunpack.i.l.bf16 %v2403_v31 }
 0x121   : > { %1108 = vmatprep.mubr.bf16.mxu0 %v898_v33  ;;  %v849_v47 = vsel %vm381_vm0, %v3055_v51, %v2410_v34  ;;  %v848_v48 = vsel %vm381_vm0, %v3053_v50, %v2409_v39 }
 0x122   : > { %1109 = vmatmul.mubr.bf16.gmra.mrb[4].mxu0 %v897_v30  ;;  %v2418_v41 = vpop.permute.xlu1 %2417  ;;  %v875_v52 = vsel %vm381_vm0, %v3082_v1, %v2405_v43  ;;  %v874_v32 = vsel %vm381_vm0, %v3063_v56, %v2404_v44 }
 0x123   : > { %v2413_v45 = vpop.permute.xlu0 %2412  ;;  %v2420_v36 = vunpack.i.h.bf16 %v2418_v41  ;;  %v2419_v46 = vunpack.i.l.bf16 %v2418_v41 }
 0x124   : > { %v2415_v37 = vunpack.i.h.bf16 %v2413_v45  ;;  %v2414_v42 = vunpack.i.l.bf16 %v2413_v45 }
 0x125   : > { %v857_v40 = vsel %vm852_vm3, %v848_v48, %v2419_v46  ;;  %v858_v57 = vsel %vm852_vm3, %v849_v47, %v2420_v36 }
 0x126   : > { %v2428_v49 = vpop.permute.xlu1 %2427  ;;  %v882_v51 = vsel %vm852_vm3, %v874_v32, %v2414_v42  ;;  %v883_v50 = vsel %vm852_vm3, %v875_v52, %v2415_v37  ;;  %v2116_v42 = vld [vmem:[%s3565_s5] ss:$0 sm:$0xff] }
 0x127   : > { %v2430_v53 = vunpack.i.h.bf16 %v2428_v49  ;;  %v2429_v38 = vunpack.i.l.bf16 %v2428_v49  ;;  %v2423_v54 = vpop.permute.xlu0 %2422 }
 0x128   : > { %v2425_v58 = vunpack.i.h.bf16 %v2423_v54  ;;  %v2424_v59 = vunpack.i.l.bf16 %v2423_v54 }
 0x129   : > { %v866_v60 = vsel %vm861_vm4, %v857_v40, %v2429_v38  ;;  %v867_v1 = vsel %vm861_vm4, %v858_v57, %v2430_v53  ;;  %v2139_v53 = vld [vmem:[%s371_s18] ss:$0 sm:$0xff] }
 0x12a   : > { %v2438_v63 = vpop.permute.xlu1 %2437  ;;  %v890_v56 = vsel %vm861_vm4, %v882_v51, %v2424_v59  ;;  %v891_v0 = vsel %vm861_vm4, %v883_v50, %v2425_v58  ;;  %v900_v3 = vpack.c.bf16 %v867_v1, %v866_v60 }
 0x12b   : > { %v2433_v4 = vpop.permute.xlu0 %2432  ;;  %v901_v5 = vpack.c.bf16 %v891_v0, %v890_v56  ;;  %v2440_v7 = vunpack.i.h.bf16 %v2438_v63  ;;  %v2439_v8 = vunpack.i.l.bf16 %v2438_v63 }
 0x12c   : > { %v2435_v10 = vunpack.i.h.bf16 %v2433_v4  ;;  %v2434_v11 = vunpack.i.l.bf16 %v2433_v4 }
 0x12d   : > { %1116 = vmatprep.mubr.bf16.mxu0 %v901_v5  ;;  %v851_v18 = vsel %vm381_vm0, %v3076_v62, %v2440_v7  ;;  %v850_v19 = vsel %vm381_vm0, %v3074_v61, %v2439_v8 }
 0x12e   : > { %1117 = vmatmul.mubr.bf16.gmra.mrb[8].mxu0 %v900_v3  ;;  %v2448_v9 = vpop.permute.xlu1 %2447  ;;  %v877_v21 = vsel %vm381_vm0, %v3101_v15, %v2435_v10  ;;  %v876_v22 = vsel %vm381_vm0, %v3084_v2, %v2434_v11 }
 0x12f   : > { %v2443_v12 = vpop.permute.xlu0 %2442  ;;  %v2450_v13 = vunpack.i.h.bf16 %v2448_v9  ;;  %v2449_v14 = vunpack.i.l.bf16 %v2448_v9 }
 0x130   : > { %v2445_v16 = vunpack.i.h.bf16 %v2443_v12  ;;  %v2444_v17 = vunpack.i.l.bf16 %v2443_v12 }
 0x131   : > { %v859_v25 = vsel %vm852_vm3, %v850_v19, %v2449_v14  ;;  %v860_v26 = vsel %vm852_vm3, %v851_v18, %v2450_v13 }
 0x132   : > { %v2458_v20 = vpop.permute.xlu1 %2457  ;;  %v884_v62 = vsel %vm852_vm3, %v876_v22, %v2444_v17  ;;  %v885_v61 = vsel %vm852_vm3, %v877_v21, %v2445_v16  ;;  %v2600_v21 = vld [vmem:[%s3568_s8 + $0x88] sm:$0xff]  }
 0x133   : > { %v2460_v23 = vunpack.i.h.bf16 %v2458_v20  ;;  %v2459_v24 = vunpack.i.l.bf16 %v2458_v20  ;;  %v2453_v27 = vpop.permute.xlu0 %2452  ;;  %v2599_v20 = vld [vmem:[%s3568_s8 + $0x80] sm:$0xff]  }
 0x134   : > { %v2455_v55 = vunpack.i.h.bf16 %v2453_v27  ;;  %v2454_v28 = vunpack.i.l.bf16 %v2453_v27  ;;  %2284 = vmatprep.subr.bf16.mxu0 %v2599_v20 }
 0x135   : > { %v868_v35 = vsel %vm861_vm4, %v859_v25, %v2459_v24  ;;  %v869_v15 = vsel %vm861_vm4, %v860_v26, %v2460_v23  ;;  %2285 = vmatpush3.bf16.msra.mxu0 %v2599_v20 }
 0x136   : > { %v892_v29 = vsel %vm861_vm4, %v884_v62, %v2454_v28  ;;  %v893_v2 = vsel %vm861_vm4, %v885_v61, %v2455_v55  ;;  %v903_v30 = vpack.c.bf16 %v869_v15, %v868_v35  ;;  %2286 = vmatprep.subr.bf16.mxu0 %v2600_v21 }
 0x137   : > { %v904_v31 = vpack.c.bf16 %v893_v2, %v892_v29 }
 0x139   : > { %1124 = vmatprep.mubr.bf16.mxu0 %v904_v31  ;;  %2287 = vmatpush3.bf16.msra.mxu0 %v2600_v21 }
 0x13a   : > { %1125 = vmatmul.mubr.bf16.gmra.mrb[12].mxu0 %v903_v30 }
 0x16d   : > { %v2278_v33 = vpop.f32.mrb[0].mxu1 }
 0x16e   : > { %v1167_v34 = vpop.f32.mrb[1].mxu1 }
 0x16f   : > { %v2279_v39 = vpop.f32.mrb[2].mxu1 }
 0x170   : > { %v1170_v41 = vpop.f32.mrb[3].mxu1 }
 0x175   : > { %v3172_v43 = vpop.f32.mrb[4].mxu1 }
 0x176   : > { %v1183_v44 = vpop.f32.mrb[5].mxu1 }
 0x177   : > { %v3174_v45 = vpop.f32.mrb[6].mxu1 }
 0x178   : > { %v1186_v36 = vpop.f32.mrb[7].mxu1 }
 0x1e9   : > { %v2196_v46 = vpop.f32.mrb[0].mxu0 }
 0x1ea   : > { %v2197_v37 = vpop.f32.mrb[1].mxu0 }
 0x1eb   : > { %v2198_v47 = vadd.f32 %v2197_v37, %v2196_v46  ;;  %v2199_v48 = vpop.f32.mrb[2].mxu0 }
 0x1ec   : > { %v2200_v49 = vpop.f32.mrb[3].mxu0 }
 0x1ed   : > { %v2201_v52 = vadd.f32 %v2200_v49, %v2199_v48  ;;  %v1103_v32 = vadd.f32 %v2198_v47, %v2116_v42 }
 0x1ef   : > { %v1168_v38 = vadd.f32 %v1167_v34, %v1103_v32  ;;  %v1106_v54 = vadd.f32 %v2201_v52, %v2116_v42 }
 0x1f1   : > { %v3183_v40 = vadd.f32 %v2139_v53, %v1168_v38  ;;  %v1171_v57 = vadd.f32 %v1170_v41, %v1106_v54 }
 0x1f3   : > { %v3185_v58 = vadd.f32 %v2139_v53, %v1171_v57  ;;  %v1215_v59 = vsel %vm381_vm0, %v3183_v40, 0.0 }
 0x1f5   : > { %v1216_v51 = vsel %vm381_vm0, %v3185_v58, 0.0  ;;  %v2202_v50 = vpop.f32.mrb[4].mxu0 }
 0x1f6   : > { %v1217_v60 = vadd.f32 %v1216_v51, %v1215_v59  ;;  %v2203_v1 = vpop.f32.mrb[5].mxu0 }
 0x1f7   : > { %v2204_v63 = vadd.f32 %v2203_v1, %v2202_v50  ;;  %v2205_v56 = vpop.f32.mrb[6].mxu0 }
 0x1f8   : > { %v2206_v0 = vpop.f32.mrb[7].mxu0 }
 0x1f9   : > { %v1111_v3 = vadd.f32 %v2204_v63, %v2116_v42  ;;  %v2207_v4 = vadd.f32 %v2206_v0, %v2205_v56 }
 0x1fb   : > { %v1176_v5 = vadd.f32 %v2278_v33, %v1111_v3  ;;  %v1114_v7 = vadd.f32 %v2207_v4, %v2116_v42 }
 0x1fd   : > { %v1207_v8 = vadd.f32 %v2139_v53, %v1176_v5  ;;  %v1179_v9 = vadd.f32 %v2279_v39, %v1114_v7 }
 0x1ff   : > { %v1218_v10 = vsel %vm381_vm0, %v1207_v8, 0.0  ;;  %v1208_v11 = vadd.f32 %v2139_v53, %v1179_v9 }
 0x200   : > { %v1219_v12 = vadd.f32 %v1218_v10, %v1217_v60 }
 0x201   : > { %v2208_v13 = vpop.f32.mrb[8].mxu0  ;;  %v1220_v14 = vsel %vm381_vm0, %v1208_v11, 0.0 }
 0x202   : > { %v2209_v16 = vpop.f32.mrb[9].mxu0  ;;  %v1221_v17 = vadd.f32 %v1220_v14, %v1219_v12  ;;  %v2601_v14 = vld [vmem:[%s3568_s8 + $0x40] sm:$0xff]  }
 0x203   : > { %v2210_v18 = vadd.f32 %v2209_v16, %v2208_v13  ;;  %v2211_v19 = vpop.f32.mrb[10].mxu0  ;;  %v2602_v16 = vld [vmem:[%s3568_s8] sm:$0xff]   ;;  %2226 = vmatprep.subr.bf16.mxu1 %v2601_v14 }
 0x204   : > { %v2212_v22 = vpop.f32.mrb[11].mxu0  ;;  %2227 = vmatpush3.bf16.msra.mxu1 %v2602_v16 }
 0x205   : > { %v2213_v23 = vadd.f32 %v2212_v22, %v2211_v19  ;;  %v1119_v24 = vadd.f32 %v2210_v18, %v2116_v42  ;;  %v2604_v22 = vld [vmem:[%s3568_s8 + $0x8] sm:$0xff]  }
 0x207   : > { %v1184_v27 = vadd.f32 %v1183_v44, %v1119_v24  ;;  %v1122_v25 = vadd.f32 %v2213_v23, %v2116_v42 }
 0x209   : > { %v1209_v26 = vadd.f32 %v2139_v53, %v1184_v27  ;;  %v1187_v55 = vadd.f32 %v1186_v36, %v1122_v25  ;;  %v2605_v27 = vld [vmem:[%s3568_s8 + $0x50] sm:$0xff]  }
 0x20b   : > { %v1222_v28 = vsel %vm381_vm0, %v1209_v26, 0.0  ;;  %v1210_v62 = vadd.f32 %v2139_v53, %v1187_v55 }
 0x20c   : > { %v1223_v61 = vadd.f32 %v1222_v28, %v1221_v17  ;;  %v2603_v17 = vld [vmem:[%s3568_s8 + $0x48] sm:$0xff]   ;;  %v2606_v28 = vld [vmem:[%s3568_s8 + $0x10] sm:$0xff]  }
 0x20d   : > { %v1224_v35 = vsel %vm381_vm0, %v1210_v62, 0.0  ;;  %v2214_v15 = vpop.f32.mrb[12].mxu0  ;;  %2228 = vmatprep.subr.bf16.mxu1 %v2603_v17 }
 0x20e   : > { %v1225_v29 = vadd.f32 %v1224_v35, %v1223_v61  ;;  %v2215_v2 = vpop.f32.mrb[13].mxu0  ;;  %2229 = vmatpush3.bf16.msra.mxu1 %v2604_v22  ;;  %v2607_v61 = vld [vmem:[%s3568_s8 + $0x58] sm:$0xff]  }
 0x20f   : > { %v2216_v30 = vadd.f32 %v2215_v2, %v2214_v15  ;;  %v2217_v31 = vpop.f32.mrb[14].mxu0  ;;  %2230 = vmatprep.subr.bf16.mxu1 %v2605_v27 }
 0x210   : > { %v2218_v33 = vpop.f32.mrb[15].mxu0 }
 0x211   : > { %v1127_v34 = vadd.f32 %v2216_v30, %v2116_v42  ;;  %v2219_v39 = vadd.f32 %v2218_v33, %v2217_v31  ;;  %v2609_v30 = vld [vmem:[%s3568_s8 + $0x60] sm:$0xff]  }
 0x212   : > { %2231 = vmatpush3.bf16.msra.mxu1 %v2606_v28  ;;  %v2610_v33 = vld [vmem:[%s3568_s8 + $0x20] sm:$0xff]  }
 0x213   : > { %v1192_v41 = vadd.f32 %v3172_v43, %v1127_v34  ;;  %v1130_v44 = vadd.f32 %v2219_v39, %v2116_v42  ;;  %2232 = vmatprep.subr.bf16.mxu1 %v2607_v61 }
 0x215   : > { %v1211_v46 = vadd.f32 %v2139_v53, %v1192_v41  ;;  %v1195_v36 = vadd.f32 %v3174_v45, %v1130_v44 }
 0x217   : > { %v1226_v37 = vsel %vm381_vm0, %v1211_v46, 0.0  ;;  %v1212_v47 = vadd.f32 %v2139_v53, %v1195_v36 }
 0x218   : > { %v1227_v48 = vadd.f32 %v1226_v37, %v1225_v29  ;;  %v2608_v29 = vld [vmem:[%s3568_s8 + $0x18] sm:$0xff]  }
 0x219   : > { %v1228_v49 = vsel %vm381_vm0, %v1212_v47, 0.0  ;;  %2233 = vmatpush3.bf16.msra.mxu1 %v2608_v29 }
 0x21a   : > { %v1229_v52 = vadd.f32 %v1228_v49, %v1227_v48  ;;  %2234 = vmatprep.subr.bf16.mxu1 %v2609_v30 }
 0x21c   : > { %v1230_v32 = vsel %vm381_vm0, %v1229_v52, 0.0 }
 0x21d   : > { %v1231_v38 = vrot.slane %v1230_v32, 4  ;;  %2235 = vmatpush3.bf16.msra.mxu1 %v2610_v33 }
 0x21f   : > { %v1232_v54 = vadd.f32 %v1231_v38, %v1230_v32  ;;  %v2141_v38 = vld [vmem:[%s3567_s7] ss:$0 sm:$0xff] }
 0x221   : > { %v1233_v57 = vrot.slane %v1232_v54, 2 }
 0x223   : > { %v1234_v59 = vadd.f32 %v1233_v57, %v1232_v54 }
 0x225   : > { %v1235_v51 = vrot.slane %v1234_v59, 1 }
 0x227   : > { %v1236_v50 = vadd.f32 %v1235_v51, %v1234_v59 }
 0x229   : > { %v1238_v43 = vmul.f32 0.015625, %v1236_v50 }
 0x22b   : > { %v3207_v42 = vsub.f32 %v3183_v40, %v1238_v43  ;;  %v3210_v45 = vsub.f32 %v3185_v58, %v1238_v43  ;;  %v3212_v53 = vsub.f32 %v1207_v8, %v1238_v43  ;;  %v3214_v60 = vsub.f32 %v1208_v11, %v1238_v43 }
 0x22c   : > { %v3216_v1 = vsub.f32 %v1209_v26, %v1238_v43  ;;  %v3218_v63 = vsub.f32 %v1210_v62, %v1238_v43  ;;  %v3220_v56 = vsub.f32 %v1211_v46, %v1238_v43  ;;  %v3222_v0 = vsub.f32 %v1212_v47, %v1238_v43  ;;  %v2140_v47 = vld [vmem:[%s3566_s6] ss:$0 sm:$0xff] }
 0x22d   : > { %v1247_v3 = vmul.f32 %v3207_v42, %v3207_v42  ;;  %v1248_v40 = vmul.f32 %v3210_v45, %v3210_v45  ;;  %v1249_v58 = vmul.f32 %v3212_v53, %v3212_v53  ;;  %v1250_v4 = vmul.f32 %v3214_v60, %v3214_v60 }
 0x22e   : > { %v1251_v9 = vmul.f32 %v3216_v1, %v3216_v1  ;;  %v1252_v12 = vmul.f32 %v3218_v63, %v3218_v63  ;;  %v1253_v19 = vmul.f32 %v3220_v56, %v3220_v56  ;;  %v1254_v23 = vmul.f32 %v3222_v0, %v3222_v0 }
 0x22f   : > { %v1255_v5 = vsel %vm381_vm0, %v1247_v3, 0.0  ;;  %v1256_v7 = vsel %vm381_vm0, %v1248_v40, 0.0  ;;  %v1258_v10 = vsel %vm381_vm0, %v1249_v58, 0.0  ;;  %v1260_v13 = vsel %vm381_vm0, %v1250_v4, 0.0 }
 0x230   : > { %v1257_v8 = vadd.f32 %v1256_v7, %v1255_v5  ;;  %v1262_v20 = vsel %vm381_vm0, %v1251_v9, 0.0  ;;  %v1264_v24 = vsel %vm381_vm0, %v1252_v12, 0.0  ;;  %v1266_v26 = vsel %vm381_vm0, %v1253_v19, 0.0 }
 0x231   : > { %v1268_v62 = vsel %vm381_vm0, %v1254_v23, 0.0 }
 0x232   : > { %v1259_v11 = vadd.f32 %v1258_v10, %v1257_v8 }
 0x234   : > { %v1261_v18 = vadd.f32 %v1260_v13, %v1259_v11 }
 0x236   : > { %v1263_v21 = vadd.f32 %v1262_v20, %v1261_v18 }
 0x238   : > { %v1265_v25 = vadd.f32 %v1264_v24, %v1263_v21 }
 0x23a   : > { %v1267_v55 = vadd.f32 %v1266_v26, %v1265_v25 }
 0x23c   : > { %v1269_v35 = vadd.f32 %v1268_v62, %v1267_v55 }
 0x23e   : > { %v1270_v15 = vsel %vm381_vm0, %v1269_v35, 0.0 }
 0x23f   : > { %v1271_v2 = vrot.slane %v1270_v15, 4 }
 0x241   : > { %v1272_v31 = vadd.f32 %v1271_v2, %v1270_v15 }
 0x243   : > { %v1273_v34 = vrot.slane %v1272_v31, 2 }
 0x245   : > { %v1274_v39 = vadd.f32 %v1273_v34, %v1272_v31 }
 0x247   : > { %v1275_v41 = vrot.slane %v1274_v39, 1 }
 0x249   : > { %v1276_v44 = vadd.f32 %v1275_v41, %v1274_v39  ;;  %v2611_v39 = vld [vmem:[%s3568_s8 + $0x68] sm:$0xff]  }
 0x24a   : > { %v2612_v41 = vld [vmem:[%s3568_s8 + $0x28] sm:$0xff]   ;;  %2236 = vmatprep.subr.bf16.mxu1 %v2611_v39 }
 0x24b   : > { %v1278_v46 = vmul.f32 0.015625, %v1276_v44  ;;  %2237 = vmatpush3.bf16.msra.mxu1 %v2612_v41  ;;  %v1445_v41 = vld [vmem:[#allocation2 + $0x91] sm:$0xff] }
 0x24d   : > { %v1279_v36 = vadd.f32 1e-05, %v1278_v46 }
 0x24f   : > { %2651 = vrsqrt.f32 %v1279_v36 }
 0x259   : > { %v2652_v37 = vpop.eup %2651 }
 0x25a   : > { %v1281_v48 = vmul.f32 %v2652_v37, %v3207_v42  ;;  %v1282_v49 = vmul.f32 %v2652_v37, %v3210_v45  ;;  %v1283_v52 = vmul.f32 %v2652_v37, %v3212_v53  ;;  %v1284_v32 = vmul.f32 %v2652_v37, %v3214_v60 }
 0x25b   : > { %v1285_v54 = vmul.f32 %v2652_v37, %v3216_v1  ;;  %v1286_v57 = vmul.f32 %v2652_v37, %v3218_v63  ;;  %v1287_v59 = vmul.f32 %v2652_v37, %v3220_v56  ;;  %v1288_v51 = vmul.f32 %v2652_v37, %v3222_v0 }
 0x25c   : > { %v1295_v50 = vmul.f32 %v2140_v47, %v1281_v48  ;;  %v1296_v43 = vmul.f32 %v2140_v47, %v1282_v49  ;;  %v1297_v42 = vmul.f32 %v2140_v47, %v1283_v52  ;;  %v1298_v45 = vmul.f32 %v2140_v47, %v1284_v32  ;;  %v2613_v32 = vld [vmem:[%s3568_s8 + $0x70] sm:$0xff]  }
 0x25d   : > { %v1299_v3 = vmul.f32 %v2140_v47, %v1285_v54  ;;  %v1300_v53 = vmul.f32 %v2140_v47, %v1286_v57  ;;  %v1301_v40 = vmul.f32 %v2140_v47, %v1287_v59  ;;  %v1302_v60 = vmul.f32 %v2140_v47, %v1288_v51  ;;  %v1390_v57 = vld [vmem:[#allocation2 + $0x1] sm:$0xff]  ;;  %2238 = vmatprep.subr.bf16.mxu1 %v2613_v32 }
 0x25e   : > { %v1309_v58 = vadd.f32 %v2141_v38, %v1295_v50  ;;  %v1310_v4 = vadd.f32 %v2141_v38, %v1296_v43  ;;  %v1311_v5 = vadd.f32 %v2141_v38, %v1297_v42  ;;  %v1312_v7 = vadd.f32 %v2141_v38, %v1298_v45 }
 0x25f   : > { %v1313_v8 = vadd.f32 %v2141_v38, %v1299_v3  ;;  %v1314_v1 = vadd.f32 %v2141_v38, %v1300_v53  ;;  %v3293_v9 = vadd.f32 %v2141_v38, %v1301_v40  ;;  %v3295_v0 = vadd.f32 %v2141_v38, %v1302_v60  ;;  %v2614_v38 = vld [vmem:[%s3568_s8 + $0x30] sm:$0xff]   ;;  %v1398_v3 = vld [vmem:[#allocation2 + $0x2] sm:$0xff] }
 0x260   : > { %v2142_v63 = vmul.f32 -1.442695, %v1309_v58  ;;  %v2143_v56 = vmul.f32 -1.442695, %v1310_v4  ;;  %v2144_v10 = vmul.f32 -1.442695, %v1311_v5  ;;  %2239 = vmatpush3.bf16.msra.mxu1 %v2614_v38 }
 0x261   : > { %v2145_v11 = vmul.f32 -1.442695, %v1312_v7  ;;  %v2146_v12 = vmul.f32 -1.442695, %v1313_v8  ;;  %v2147_v13 = vmul.f32 -1.442695, %v1314_v1 }
 0x262   : > { %2653 = vpow2.f32 %v2142_v63  ;;  %v2148_v14 = vmul.f32 -1.442695, %v3293_v9  ;;  %v2149_v16 = vmul.f32 -1.442695, %v3295_v0  ;;  %v1382_v38 = vld [vmem:[#allocation2] sm:$0xff] }
 0x263   : > { %2655 = vpow2.f32 %v2143_v56 }
 0x264   : > { %2657 = vpow2.f32 %v2144_v10 }
 0x265   : > { %2659 = vpow2.f32 %v2145_v11  ;;  %v2615_v11 = vld [vmem:[%s3568_s8 + $0x78] sm:$0xff]  }
 0x266   : > { %2661 = vpow2.f32 %v2146_v12  ;;  %v2616_v12 = vld [vmem:[%s3568_s8 + $0x38] sm:$0xff]   ;;  %2240 = vmatprep.subr.bf16.mxu1 %v2615_v11 }
 0x267   : > { %2663 = vpow2.f32 %v2147_v13  ;;  %2241 = vmatpush3.bf16.msra.mxu1 %v2616_v12 }
 0x268   : > { %2665 = vpow2.f32 %v2148_v14 }
 0x269   : > { %2667 = vpow2.f32 %v2149_v16 }
 0x26c   : > { %v2654_v17 = vpop.eup %2653 }
 0x26d   : > { %v2656_v18 = vpop.eup %2655  ;;  %v1341_v19 = vadd.f32 1.0, %v2654_v17 }
 0x26e   : > { %v2658_v20 = vpop.eup %2657  ;;  %v1342_v21 = vadd.f32 1.0, %v2656_v18 }
 0x26f   : > { %v2660_v22 = vpop.eup %2659  ;;  %v1343_v23 = vadd.f32 1.0, %v2658_v20  ;;  %2669 = vrcp.f32 %v1341_v19 }
 0x270   : > { %v2662_v24 = vpop.eup %2661  ;;  %v1344_v27 = vadd.f32 1.0, %v2660_v22  ;;  %2671 = vrcp.f32 %v1342_v21 }
 0x271   : > { %v2664_v25 = vpop.eup %2663  ;;  %v1345_v26 = vadd.f32 1.0, %v2662_v24  ;;  %2673 = vrcp.f32 %v1343_v23 }
 0x272   : > { %v2666_v55 = vpop.eup %2665  ;;  %v1346_v28 = vadd.f32 1.0, %v2664_v25  ;;  %2675 = vrcp.f32 %v1344_v27 }
 0x273   : > { %v2668_v62 = vpop.eup %2667  ;;  %v1347_v61 = vadd.f32 1.0, %v2666_v55  ;;  %2677 = vrcp.f32 %v1345_v26 }
 0x274   : > { %v1348_v35 = vadd.f32 1.0, %v2668_v62  ;;  %2679 = vrcp.f32 %v1346_v28 }
 0x275   : > { %2681 = vrcp.f32 %v1347_v61 }
 0x276   : > { %2683 = vrcp.f32 %v1348_v35 }
 0x279   : > { %v2670_v15 = vpop.eup %2669 }
 0x27a   : > { %v2672_v29 = vpop.eup %2671  ;;  %v1365_v2 = vmul.f32 %v2670_v15, %v1309_v58 }
 0x27b   : > { %v2674_v30 = vpop.eup %2673  ;;  %v1366_v31 = vmul.f32 %v2672_v29, %v1310_v4 }
 0x27c   : > { %v2676_v33 = vpop.eup %2675  ;;  %v1367_v34 = vmul.f32 %v2674_v30, %v1311_v5  ;;  %1373 = vst.msk [vmem:[#allocation2 + $0x11] sm:$0xff] %vm381_vm0, %v1365_v2 }
 0x27d   : > { %v2678_v44 = vpop.eup %2677  ;;  %v1368_v46 = vmul.f32 %v2676_v33, %v1312_v7  ;;  %1374 = vst.msk [vmem:[#allocation2 + $0x21] sm:$0xff] %vm381_vm0, %v1366_v31  ;;  %v1437_v31 = vld [vmem:[#allocation2 + $0x90] sm:$0xff] }
 0x27e   : > { %v2680_v36 = vpop.eup %2679  ;;  %v1369_v37 = vmul.f32 %v2678_v44, %v1313_v8  ;;  %1375 = vst.msk [vmem:[#allocation2 + $0x31] sm:$0xff] %vm381_vm0, %v1367_v34 }
 0x27f   : > { %v2682_v47 = vpop.eup %2681  ;;  %v1370_v48 = vmul.f32 %v2680_v36, %v1314_v1  ;;  %1376 = vst.msk [vmem:[#allocation2 + $0x41] sm:$0xff] %vm381_vm0, %v1368_v46 }
 0x280   : > { %v2684_v49 = vpop.eup %2683  ;;  %v1371_v52 = vmul.f32 %v2682_v47, %v3293_v9  ;;  %1377 = vst.msk [vmem:[#allocation2 + $0x51] sm:$0xff] %vm381_vm0, %v1369_v37 }
 0x281   : > { %v1372_v54 = vmul.f32 %v2684_v49, %v3295_v0  ;;  %1378 = vst.msk [vmem:[#allocation2 + $0x61] sm:$0xff] %vm381_vm0, %v1370_v48 }
 0x282   : > { %1379 = vst.msk [vmem:[#allocation2 + $0x71] sm:$0xff] %vm381_vm0, %v1371_v52 }
 0x283   : > { %1380 = vst.msk [vmem:[#allocation2 + $0x81] sm:$0xff] %vm381_vm0, %v1372_v54  ;;  %v1422_v59 = vld [vmem:[#allocation2 + $0x12] sm:$0xff] }
 0x284   : > { %v3321_v51 = vld [vmem:[#allocation2 + $0x11] sm:$0xff]  ;;  %v1446_v50 = vld [vmem:[#allocation2 + $0x22] sm:$0xff]  ;;  %v2476_v8 = vpack.i.bf16 %v1422_v59, %v1398_v3 }
 0x285   : > { %v2466_v43 = vpack.i.bf16 %v3321_v51, %v1390_v57  ;;  %v1447_v42 = vld [vmem:[#allocation2 + $0x32] sm:$0xff]  ;;  %v2461_v45 = vpack.i.bf16 %v1446_v50, %v1422_v59  ;;  %v3325_v60 = vld [vmem:[#allocation2 + $0x20] sm:$0xff] }
 0x286   : > { %v1696_v53 = vpack.c.bf16 %v1447_v42, %v1446_v50  ;;  %v1448_v40 = vld [vmem:[#allocation2 + $0x42] sm:$0xff]  ;;  %v3327_v58 = vld [vmem:[#allocation2 + $0x30] sm:$0xff]  ;;  %v2506_v21 = vpack.i.bf16 %v1447_v42, %v1446_v50 }
 0x287   : > { %2467 = vrot.lane.b32.xlu1 %v2466_v43, %s2759_s26  ;;  %2462 = vrot.lane.b32.xlu0 %v2461_v45, %s2759_s26  ;;  %v1449_v4 = vld [vmem:[#allocation2 + $0x52] sm:$0xff]  ;;  %v2471_v9 = vpack.i.bf16 %v3327_v58, %v3325_v60  ;;  %v3337_v10 = vld [vmem:[#allocation2 + $0x21] sm:$0xff]  ;;  %v2491_v18 = vpack.i.bf16 %v1448_v40, %v1447_v42 }
 0x288   : > { %2288 = vmatprep.mubr.msk.bf16.mxu0 %vm381_vm0, %v1696_v53  ;;  %v1699_v5 = vpack.c.bf16 %v1449_v4, %v1448_v40  ;;  %v1450_v7 = vld [vmem:[#allocation2 + $0x62] sm:$0xff]  ;;  %v3333_v63 = vld [vmem:[#allocation2 + $0x10] sm:$0xff]  ;;  %v2536_v28 = vpack.i.bf16 %v1449_v4, %v1448_v40 }
 0x289   : > { %v1451_v1 = vld [vmem:[#allocation2 + $0x72] sm:$0xff]  ;;  %v2486_v13 = vpack.i.bf16 %v3325_v60, %v3333_v63  ;;  %v3358_v19 = vld [vmem:[#allocation2 + $0x40] sm:$0xff]  ;;  %v2521_v25 = vpack.i.bf16 %v1450_v7, %v1449_v4 }
 0x28a   : > { %2289 = vmatmul.mubr.msk.bf16.vlgmr.msra.gmra.mrb[16].mxu0 %vm381_vm0, %v1699_v5  ;;  %v1702_v56 = vpack.c.bf16 %v1451_v1, %v1450_v7  ;;  %v3339_v0 = vld [vmem:[#allocation2 + $0x31] sm:$0xff]  ;;  %v1452_v16 = vld [vmem:[#allocation2 + $0x82] sm:$0xff]  ;;  %v2516_v24 = vpack.i.bf16 %v3358_v19, %v3327_v58  ;;  %v2566_v33 = vpack.i.bf16 %v1451_v1, %v1450_v7 }
 0x28b   : > { %2477 = vrot.lane.b32.xlu1 %v2476_v8, %s3577_s21  ;;  %2472 = vrot.lane.b32.xlu0 %v2471_v9, %s3577_s21  ;;  %v2481_v14 = vpack.i.bf16 %v3339_v0, %v3337_v10  ;;  %v1705_v17 = vpack.c.bf16 %v3086_v6, %v1452_v16  ;;  %v3360_v20 = vld [vmem:[#allocation2 + $0x50] sm:$0xff]  ;;  %v3366_v23 = vld [vmem:[#allocation2 + $0x41] sm:$0xff]  ;;  %v2551_v2 = vpack.i.bf16 %v1452_v16, %v1451_v1 }
 0x28c   : > { %2292 = vmatprep.mubr.msk.bf16.mxu0 %vm381_vm0, %v1702_v56  ;;  %v2501_v22 = vpack.i.bf16 %v3360_v20, %v3358_v19  ;;  %v3368_v6 = vld [vmem:[#allocation2 + $0x51] sm:$0xff]  ;;  %v3378_v26 = vld [vmem:[#allocation2 + $0x60] sm:$0xff] }
 0x28d   : > { %v2511_v27 = vpack.i.bf16 %v3368_v6, %v3366_v23  ;;  %v3380_v55 = vld [vmem:[#allocation2 + $0x70] sm:$0xff]  ;;  %v3386_v61 = vld [vmem:[#allocation2 + $0x61] sm:$0xff]  ;;  %v2546_v15 = vpack.i.bf16 %v3378_v26, %v3360_v20 }
 0x28e   : > { %v2531_v62 = vpack.i.bf16 %v3380_v55, %v3378_v26  ;;  %v3388_v35 = vld [vmem:[#allocation2 + $0x71] sm:$0xff]  ;;  %v1436_v30 = vld [vmem:[#allocation2 + $0x80] sm:$0xff] }
 0x28f   : > { %2487 = vrot.lane.b32.xlu1 %v2486_v13, %s3578_s28  ;;  %2482 = vrot.lane.b32.xlu0 %v2481_v14, %s3578_s28  ;;  %v2541_v29 = vpack.i.bf16 %v3388_v35, %v3386_v61  ;;  %v2561_v34 = vpack.i.bf16 %v1437_v31, %v1436_v30  ;;  %v3400_v39 = vld [vmem:[#allocation2 + $0x81] sm:$0xff]  ;;  %v2576_v44 = vpack.i.bf16 %v1436_v30, %v3380_v55 }
 0x290   : > { %v2571_v46 = vpack.i.bf16 %v1445_v41, %v3400_v39 }
 0x292   : > { %2293 = vmatmul.mubr.msk.bf16.gmra.mrb[20].mxu0 %vm381_vm0, %v1705_v17 }
 0x293   : > { %2497 = vrot.lane.b32.xlu1 %v2481_v14, %s2759_s26  ;;  %2492 = vrot.lane.b32.xlu0 %v2491_v18, %s2759_s26 }
 0x297   : > { %2507 = vrot.lane.b32.xlu1 %v2506_v21, %s3577_s21  ;;  %2502 = vrot.lane.b32.xlu0 %v2501_v22, %s3577_s21 }
 0x29b   : > { %2517 = vrot.lane.b32.xlu1 %v2516_v24, %s3578_s28  ;;  %2512 = vrot.lane.b32.xlu0 %v2511_v27, %s3578_s28 }
 0x29f   : > { %2527 = vrot.lane.b32.xlu1 %v2511_v27, %s2759_s26  ;;  %2522 = vrot.lane.b32.xlu0 %v2521_v25, %s2759_s26 }
 0x2a3   : > { %2537 = vrot.lane.b32.xlu1 %v2536_v28, %s3577_s21  ;;  %2532 = vrot.lane.b32.xlu0 %v2531_v62, %s3577_s21 }
 0x2a7   : > { %2547 = vrot.lane.b32.xlu1 %v2546_v15, %s3578_s28  ;;  %2542 = vrot.lane.b32.xlu0 %v2541_v29, %s3578_s28 }
 0x2ab   : > { %2557 = vrot.lane.b32.xlu1 %v2541_v29, %s2759_s26  ;;  %2552 = vrot.lane.b32.xlu0 %v2551_v2, %s2759_s26  ;;  %s361_s26 = sand.u32 1, %s2747_s14  }
 0x2ac   : > { %s2103_s27 = sshll.u32 %s361_s26, 6  ;;  %s3519_s17 = scalar_lea.sflag [#allocation4], %s361_s26 }
 0x2ad   : > { %s3481_s11 = scalar_lea.vmem [#allocation3], %s2103_s27  ;;  %s2697_s27 = sshll.u32 %s2761_s30, 4  ;;  %s2698_s27 = int_to_ptr.vmem [resolvable:$false] %s2697_s27 }
 0x2ae   : > { %s2028_s18 = sshll.u32 %s3481_s11, 4  ;;  %s3510_s18 = int_to_ptr.vmem [resolvable:$true] %s2028_s18 }
 0x2af   : > { %2567 = vrot.lane.b32.xlu1 %v2566_v33, %s3577_s21  ;;  %2562 = vrot.lane.b32.xlu0 %v2561_v34, %s3577_s21  ;;  %s2693_s21 = scalar_lea.vmem %s3510_s18, 1024  ;;  %p2700_p0 = scmp.lt.s32.totalorder %s3510_s18, %s2698_s27 }
 0x2b0   : > { %p2694_p11 = scmp.ne.s32.totalorder %s3510_s18, %s2693_s21 }
 0x2b2   : > { %p2695_p12 = pnand %p2694_p11, %p2857_p5 }
 0x2b3   : > { %2577 = vrot.lane.b32.xlu1 %v2576_v44, %s3578_s28  ;;  %2572 = vrot.lane.b32.xlu0 %v2571_v46, %s3578_s28  ;;  %s3508_s28 = scalar_lea.hbm %s3570_s10, %s2179_s12  ;;  %s2699_s12 = scalar_lea.vmem %s2698_s27, 2048 }
 0x2b4   : > { %p2696_p13 = pneg %p2695_p12  ;;  %p2701_p1 = scmp.lt.s32.totalorder %s2699_s12, %s2693_s21 }
 0x2b6   : > { %p2702_p2 = por %p2701_p1, %p2700_p0 }
 0x2b8   : > { %p2703_p3 = pnand %p2702_p2, %p2696_p13 }
 0x2f9   : > { %v2468_v36 = vpop.permute.xlu1 %2467  ;;  %v2463_v37 = vpop.permute.xlu0 %2462 }
 0x2fa   : > { %v2470_v47 = vunpack.i.h.bf16 %v2468_v36  ;;  %v2469_v48 = vunpack.i.l.bf16 %v2468_v36  ;;  %v2465_v52 = vunpack.i.h.bf16 %v2463_v37  ;;  %v2464_v32 = vunpack.i.l.bf16 %v2463_v37 }
 0x2fc   : > { %v1646_v42 = vsel %vm381_vm0, %v1382_v38, %v2469_v48  ;;  %v1647_v45 = vsel %vm381_vm0, %v3333_v63, %v2470_v47  ;;  %v1671_v53 = vsel %vm381_vm0, %v3337_v10, %v2465_v52  ;;  %v1670_v40 = vsel %vm381_vm0, %v3321_v51, %v2464_v32 }
 0x2fd   : > { %v2478_v49 = vpop.permute.xlu1 %2477  ;;  %v2473_v54 = vpop.permute.xlu0 %2472 }
 0x2fe   : > { %v2480_v57 = vunpack.i.h.bf16 %v2478_v49  ;;  %v2479_v59 = vunpack.i.l.bf16 %v2478_v49  ;;  %v2475_v50 = vunpack.i.h.bf16 %v2473_v54  ;;  %v2474_v43 = vunpack.i.l.bf16 %v2473_v54 }
 0x300   : > { %v1654_v8 = vsel %vm852_vm3, %v1646_v42, %v2479_v59  ;;  %v1655_v1 = vsel %vm852_vm3, %v1647_v45, %v2480_v57  ;;  %v1678_v11 = vsel %vm852_vm3, %v1670_v40, %v2474_v43  ;;  %v1679_v63 = vsel %vm852_vm3, %v1671_v53, %v2475_v50 }
 0x301   : > { %v2488_v3 = vpop.permute.xlu1 %2487  ;;  %v2483_v4 = vpop.permute.xlu0 %2482 }
 0x302   : > { %v2490_v5 = vunpack.i.h.bf16 %v2488_v3  ;;  %v2489_v7 = vunpack.i.l.bf16 %v2488_v3  ;;  %v2485_v9 = vunpack.i.h.bf16 %v2483_v4  ;;  %v2484_v56 = vunpack.i.l.bf16 %v2483_v4 }
 0x304   : > { %v1662_v12 = vsel %vm861_vm4, %v1654_v8, %v2489_v7  ;;  %v1663_v10 = vsel %vm861_vm4, %v1655_v1, %v2490_v5  ;;  %v1686_v51 = vsel %vm861_vm4, %v1678_v11, %v2484_v56  ;;  %v1687_v16 = vsel %vm861_vm4, %v1679_v63, %v2485_v9 }
 0x305   : > { %v1694_v13 = vpack.c.bf16 %v1663_v10, %v1662_v12  ;;  %v2498_v14 = vpop.permute.xlu1 %2497  ;;  %v2493_v17 = vpop.permute.xlu0 %2492  ;;  %v1695_v18 = vpack.c.bf16 %v1687_v16, %v1686_v51 }
 0x306   : > { %v2500_v21 = vunpack.i.h.bf16 %v2498_v14  ;;  %v2499_v22 = vunpack.i.l.bf16 %v2498_v14  ;;  %v2495_v27 = vunpack.i.h.bf16 %v2493_v17  ;;  %v2494_v25 = vunpack.i.l.bf16 %v2493_v17 }
 0x307   : > { %1900 = vmatprep.mubr.bf16.mxu1 %v1695_v18 }
 0x308   : > { %1901 = vmatmul.mubr.bf16.vlgmr.msra.gmra.mrb[8].mxu1 %v1694_v13  ;;  %v1649_v30 = vsel %vm381_vm0, %v3327_v58, %v2500_v21  ;;  %v1648_v31 = vsel %vm381_vm0, %v3325_v60, %v2499_v22  ;;  %v1673_v34 = vsel %vm381_vm0, %v3366_v23, %v2495_v27  ;;  %v1672_v41 = vsel %vm381_vm0, %v3339_v0, %v2494_v25 }
 0x309   : > { %v2508_v24 = vpop.permute.xlu1 %2507  ;;  %v2503_v28 = vpop.permute.xlu0 %2502 }
 0x30a   : > { %v2510_v62 = vunpack.i.h.bf16 %v2508_v24  ;;  %v2509_v15 = vunpack.i.l.bf16 %v2508_v24  ;;  %v2505_v29 = vunpack.i.h.bf16 %v2503_v28  ;;  %v2504_v2 = vunpack.i.l.bf16 %v2503_v28 }
 0x30c   : > { %v1656_v37 = vsel %vm852_vm3, %v1648_v31, %v2509_v15  ;;  %v1657_v47 = vsel %vm852_vm3, %v1649_v30, %v2510_v62  ;;  %v1680_v58 = vsel %vm852_vm3, %v1672_v41, %v2504_v2  ;;  %v1681_v60 = vsel %vm852_vm3, %v1673_v34, %v2505_v29 }
 0x30d   : > { %v2518_v33 = vpop.permute.xlu1 %2517  ;;  %v2513_v44 = vpop.permute.xlu0 %2512 }
 0x30e   : > { %v2520_v46 = vunpack.i.h.bf16 %v2518_v33  ;;  %v2519_v36 = vunpack.i.l.bf16 %v2518_v33  ;;  %v2515_v48 = vunpack.i.h.bf16 %v2513_v44  ;;  %v2514_v49 = vunpack.i.l.bf16 %v2513_v44 }
 0x310   : > { %v1664_v52 = vsel %vm861_vm4, %v1656_v37, %v2519_v36  ;;  %v1665_v23 = vsel %vm861_vm4, %v1657_v47, %v2520_v46  ;;  %v1688_v0 = vsel %vm861_vm4, %v1680_v58, %v2514_v49  ;;  %v1689_v38 = vsel %vm861_vm4, %v1681_v60, %v2515_v48 }
 0x311   : > { %v2528_v32 = vpop.permute.xlu1 %2527  ;;  %v1697_v54 = vpack.c.bf16 %v1665_v23, %v1664_v52  ;;  %v2523_v57 = vpop.permute.xlu0 %2522  ;;  %v1698_v59 = vpack.c.bf16 %v1689_v38, %v1688_v0 }
 0x312   : > { %v2530_v50 = vunpack.i.h.bf16 %v2528_v32  ;;  %v2529_v43 = vunpack.i.l.bf16 %v2528_v32  ;;  %v2525_v45 = vunpack.i.h.bf16 %v2523_v57  ;;  %v2524_v3 = vunpack.i.l.bf16 %v2523_v57 }
 0x313   : > { %1908 = vmatprep.mubr.bf16.mxu1 %v1698_v59 }
 0x314   : > { %1909 = vmatmul.mubr.bf16.gmra.mrb[12].mxu1 %v1697_v54  ;;  %v1651_v8 = vsel %vm381_vm0, %v3360_v20, %v2530_v50  ;;  %v1650_v1 = vsel %vm381_vm0, %v3358_v19, %v2529_v43  ;;  %v1675_v56 = vsel %vm381_vm0, %v3386_v61, %v2525_v45  ;;  %v1674_v11 = vsel %vm381_vm0, %v3368_v6, %v2524_v3 }
 0x315   : > { %v2538_v42 = vpop.permute.xlu1 %2537  ;;  %v2533_v53 = vpop.permute.xlu0 %2532 }
 0x316   : > { %v2540_v40 = vunpack.i.h.bf16 %v2538_v42  ;;  %v2539_v4 = vunpack.i.l.bf16 %v2538_v42  ;;  %v2535_v5 = vunpack.i.h.bf16 %v2533_v53  ;;  %v2534_v7 = vunpack.i.l.bf16 %v2533_v53 }
 0x318   : > { %v1658_v13 = vsel %vm852_vm3, %v1650_v1, %v2539_v4  ;;  %v1659_v14 = vsel %vm852_vm3, %v1651_v8, %v2540_v40  ;;  %v1682_v20 = vsel %vm852_vm3, %v1674_v11, %v2534_v7  ;;  %v1683_v19 = vsel %vm852_vm3, %v1675_v56, %v2535_v5  ;;  %v2150_v4 = vld [vmem:[%s3569_s9] ss:$0 sm:$0xff] }
 0x319   : > { %v2548_v9 = vpop.permute.xlu1 %2547  ;;  %v2543_v63 = vpop.permute.xlu0 %2542 }
 0x31a   : > { %v2550_v12 = vunpack.i.h.bf16 %v2548_v9  ;;  %v2549_v10 = vunpack.i.l.bf16 %v2548_v9  ;;  %v2545_v51 = vunpack.i.h.bf16 %v2543_v63  ;;  %v2544_v16 = vunpack.i.l.bf16 %v2543_v63 }
 0x31c   : > { %v1666_v17 = vsel %vm861_vm4, %v1658_v13, %v2549_v10  ;;  %v1667_v61 = vsel %vm861_vm4, %v1659_v14, %v2550_v12  ;;  %v1690_v6 = vsel %vm861_vm4, %v1682_v20, %v2544_v16  ;;  %v1691_v21 = vsel %vm861_vm4, %v1683_v19, %v2545_v51  ;;  %v2685_v12 = vld [vmem:[%s2899_s29] sm:$0xff]  ;;  %v2686_v14 = vld [vmem:[%s2899_s29 + $0x8] sm:$0xff] }
 0x31d   : > { %v2558_v18 = vpop.permute.xlu1 %2557  ;;  %v1700_v22 = vpack.c.bf16 %v1667_v61, %v1666_v17  ;;  %v2553_v24 = vpop.permute.xlu0 %2552  ;;  %v1701_v27 = vpack.c.bf16 %v1691_v21, %v1690_v6 }
 0x31e   : > { %v2560_v25 = vunpack.i.h.bf16 %v2558_v18  ;;  %v2559_v28 = vunpack.i.l.bf16 %v2558_v18  ;;  %v2555_v15 = vunpack.i.h.bf16 %v2553_v24  ;;  %v2554_v29 = vunpack.i.l.bf16 %v2553_v24  ;;  %v2687_v24 = vld [vmem:[%s2899_s29 + $0x10] sm:$0xff] }
 0x31f   : > { %1916 = vmatprep.mubr.bf16.mxu1 %v1701_v27 }
 0x320   : > { %1917 = vmatmul.mubr.bf16.gmra.mrb[16].mxu1 %v1700_v22  ;;  %v1653_v41 = vsel %vm381_vm0, %v3380_v55, %v2560_v25  ;;  %v1652_v44 = vsel %vm381_vm0, %v3378_v26, %v2559_v28  ;;  %v1677_v36 = vsel %vm381_vm0, %v3400_v39, %v2555_v15  ;;  %v1676_v37 = vsel %vm381_vm0, %v3388_v35, %v2554_v29  ;;  %v2688_v28 = vld [vmem:[%s2899_s29 + $0x18] sm:$0xff] }
 0x321   : > { %v2568_v62 = vpop.permute.xlu1 %2567  ;;  %v2563_v2 = vpop.permute.xlu0 %2562 }
 0x322   : > { %v2570_v30 = vunpack.i.h.bf16 %v2568_v62  ;;  %v2569_v31 = vunpack.i.l.bf16 %v2568_v62  ;;  %v2565_v33 = vunpack.i.h.bf16 %v2563_v2  ;;  %v2564_v34 = vunpack.i.l.bf16 %v2563_v2 }
 0x324   : > { %v1660_v58 = vsel %vm852_vm3, %v1652_v44, %v2569_v31  ;;  %v1661_v60 = vsel %vm852_vm3, %v1653_v41, %v2570_v30  ;;  %v1684_v55 = vsel %vm852_vm3, %v1676_v37, %v2564_v34  ;;  %v1685_v26 = vsel %vm852_vm3, %v1677_v36, %v2565_v33 }
 0x325   : > { %v2578_v46 = vpop.permute.xlu1 %2577  ;;  %v2573_v47 = vpop.permute.xlu0 %2572 }
 0x326   : > { %v2580_v48 = vunpack.i.h.bf16 %v2578_v46  ;;  %v2579_v49 = vunpack.i.l.bf16 %v2578_v46  ;;  %v2575_v52 = vunpack.i.h.bf16 %v2573_v47  ;;  %v2574_v23 = vunpack.i.l.bf16 %v2573_v47  ;;  %v2689_v46 = vld [vmem:[%s2899_s29 + $0x20] sm:$0xff]  ;;  %v2690_v47 = vld [vmem:[%s2899_s29 + $0x28] sm:$0xff] }
 0x328   : > { %v1668_v32 = vsel %vm861_vm4, %v1660_v58, %v2579_v49  ;;  %v1669_v39 = vsel %vm861_vm4, %v1661_v60, %v2580_v48  ;;  %v1692_v35 = vsel %vm861_vm4, %v1684_v55, %v2574_v23  ;;  %v1693_v0 = vsel %vm861_vm4, %v1685_v26, %v2575_v52 }
 0x329   : > { %v1703_v38 = vpack.c.bf16 %v1669_v39, %v1668_v32  ;;  %v1704_v54 = vpack.c.bf16 %v1693_v0, %v1692_v35  ;;  %v2691_v35 = vld [vmem:[%s2899_s29 + $0x30] sm:$0xff] }
 0x32b   : > { %1924 = vmatprep.mubr.bf16.mxu1 %v1704_v54  ;;  %v2692_v54 = vld [vmem:[%s2899_s29 + $0x38] sm:$0xff] }
 0x32c   : > { %1925 = vmatmul.mubr.bf16.gmra.mrb[20].mxu1 %v1703_v38 }
 0x35d   : > { %v2290_v57 = vpop.f32.mrb[16].mxu0 }
 0x35e   : > { %v1967_v59 = vpop.f32.mrb[17].mxu0 }
 0x35f   : > { %v2291_v50 = vpop.f32.mrb[18].mxu0 }
 0x360   : > { %v1970_v43 = vpop.f32.mrb[19].mxu0 }
 0x365   : > { %v3470_v42 = vpop.f32.mrb[20].mxu0 }
 0x366   : > { %v1983_v45 = vpop.f32.mrb[21].mxu0 }
 0x367   : > { %v3472_v3 = vpop.f32.mrb[22].mxu0 }
 0x368   : > { %v1986_v53 = vpop.f32.mrb[23].mxu0 }
 0x3db   : > { %v2242_v40 = vpop.f32.mrb[8].mxu1 }
 0x3dc   : > { %v2243_v5 = vpop.f32.mrb[9].mxu1 }
 0x3dd   : > { %v2244_v7 = vadd.f32 %v2243_v5, %v2242_v40  ;;  %v2245_v8 = vpop.f32.mrb[10].mxu1 }
 0x3de   : > { %v2246_v1 = vpop.f32.mrb[11].mxu1 }
 0x3df   : > { %v1903_v9 = vadd.f32 %v2244_v7, %v2150_v4  ;;  %v2247_v56 = vadd.f32 %v2246_v1, %v2245_v8 }
 0x3e1   : > { %v1968_v11 = vadd.f32 %v1967_v59, %v1903_v9  ;;  %v1906_v63 = vadd.f32 %v2247_v56, %v2150_v4 }
 0x3e3   : > { %v1998_v10 = vadd.f32 %v2685_v12, %v1968_v11  ;;  %v1971_v13 = vadd.f32 %v1970_v43, %v1906_v63 }
 0x3e5   : > { %2006 = vst.msk [vmem:[%s3481_s11] sm:$0xff] %vm381_vm0, %v1998_v10  ;;  %v1999_v51 = vadd.f32 %v2686_v14, %v1971_v13 }
 0x3e7   : > { %2007 = vst.msk [vmem:[%s3481_s11 + $0x8] sm:$0xff] %vm381_vm0, %v1999_v51  ;;  %v2248_v16 = vpop.f32.mrb[12].mxu1 }
 0x3e8   : > { %v2249_v20 = vpop.f32.mrb[13].mxu1 }
 0x3e9   : > { %v2250_v19 = vadd.f32 %v2249_v20, %v2248_v16  ;;  %v2251_v17 = vpop.f32.mrb[14].mxu1 }
 0x3ea   : > { %v2252_v61 = vpop.f32.mrb[15].mxu1 }
 0x3eb   : > { %v1911_v18 = vadd.f32 %v2250_v19, %v2150_v4  ;;  %v2253_v6 = vadd.f32 %v2252_v61, %v2251_v17 }
 0x3ed   : > { %v1976_v21 = vadd.f32 %v2290_v57, %v1911_v18  ;;  %v1914_v22 = vadd.f32 %v2253_v6, %v2150_v4 }
 0x3ef   : > { %v2000_v27 = vadd.f32 %v2687_v24, %v1976_v21  ;;  %v1979_v25 = vadd.f32 %v2291_v50, %v1914_v22 }
 0x3f1   : > { %2008 = vst.msk [vmem:[%s3481_s11 + $0x10] sm:$0xff] %vm381_vm0, %v2000_v27  ;;  %v2001_v62 = vadd.f32 %v2688_v28, %v1979_v25 }
 0x3f3   : > { %2009 = vst.msk [vmem:[%s3481_s11 + $0x18] sm:$0xff] %vm381_vm0, %v2001_v62  ;;  %v2254_v15 = vpop.f32.mrb[16].mxu1 }
 0x3f4   : > { %v2255_v29 = vpop.f32.mrb[17].mxu1 }
 0x3f5   : > { %v2256_v2 = vadd.f32 %v2255_v29, %v2254_v15  ;;  %v2257_v30 = vpop.f32.mrb[18].mxu1 }
 0x3f6   : > { %v2258_v31 = vpop.f32.mrb[19].mxu1 }
 0x3f7   : > { %v1919_v33 = vadd.f32 %v2256_v2, %v2150_v4  ;;  %v2259_v34 = vadd.f32 %v2258_v31, %v2257_v30 }
 0x3f9   : > { %v1984_v41 = vadd.f32 %v1983_v45, %v1919_v33  ;;  %v1922_v44 = vadd.f32 %v2259_v34, %v2150_v4 }
 0x3fb   : > { %v2002_v36 = vadd.f32 %v2689_v46, %v1984_v41  ;;  %v1987_v37 = vadd.f32 %v1986_v53, %v1922_v44 }
 0x3fd   : > { %2010 = vst.msk [vmem:[%s3481_s11 + $0x20] sm:$0xff] %vm381_vm0, %v2002_v36  ;;  %v2003_v48 = vadd.f32 %v2690_v47, %v1987_v37 }
 0x3ff   : > { %2011 = vst.msk [vmem:[%s3481_s11 + $0x28] sm:$0xff] %vm381_vm0, %v2003_v48  ;;  %v2260_v49 = vpop.f32.mrb[20].mxu1 }
 0x400   : > { %v2261_v58 = vpop.f32.mrb[21].mxu1 }
 0x401   : > { %v2262_v60 = vadd.f32 %v2261_v58, %v2260_v49  ;;  %v2263_v52 = vpop.f32.mrb[22].mxu1 }
 0x402   : > { %v2264_v23 = vpop.f32.mrb[23].mxu1 }
 0x403   : > { %v1927_v55 = vadd.f32 %v2262_v60, %v2150_v4  ;;  %v2265_v26 = vadd.f32 %v2264_v23, %v2263_v52 }
 0x405   : > { %v1992_v32 = vadd.f32 %v3470_v42, %v1927_v55  ;;  %v1930_v39 = vadd.f32 %v2265_v26, %v2150_v4 }
 0x407   : > { %v2004_v0 = vadd.f32 %v2691_v35, %v1992_v32  ;;  %v1995_v38 = vadd.f32 %v3472_v3, %v1930_v39 }
 0x409   : > { %2012 = vst.msk [vmem:[%s3481_s11 + $0x30] sm:$0xff] %vm381_vm0, %v2004_v0  ;;  %v2005_v57 = vadd.f32 %v2692_v54, %v1995_v38 }
 0x40b   : > { %2013 = vst.msk [vmem:[%s3481_s11 + $0x38] sm:$0xff] %vm381_vm0, %v2005_v57 }
 0x40c   : > { %2706 = shalt.err (!%p2703_p3)
}
 0x40d   : > { %s2707_s29 = scalar_lea.hbm %s3508_s28, 1024  ;;  %s2711_s25 = scalar_lea.hbm %s3570_s10, 2048 }
 0x40e   : > { %p2708_p4 = scmp.ne.s32.totalorder %s3508_s28, %s2707_s29  ;;  %p2712_p9 = scmp.lt.u32.totalorder %s3508_s28, %s3570_s10 }
 0x40f   : > { %p2713_p10 = scmp.lt.u32.totalorder %s2711_s25, %s2707_s29  ;;  %p2715_p12 = scmp.lt.u32.totalorder %s2707_s29, %s3508_s28 }
 0x410   : > { %p2709_p7 = pnand %p2708_p4, %p2857_p5 }
 0x411   : > { %p2714_p11 = por %p2713_p10, %p2712_p9 }
 0x412   : > { %p2710_p8 = pneg %p2709_p7 }
 0x413   : > { %p2716_p13 = por %p2715_p12, %p2714_p11 }
 0x415   : > { %p2717_p0 = pnand %p2716_p13, %p2710_p8 }
 0x417   : > { %2720 = shalt.err (!%p2717_p0)
}
 0x418   : > { %s2762_s21 = smov 128   ;;  %s2763_s27 = smov 8  }
 0x419   : > { %2296 = dma.vmem_to_hbm [thread:$0]  (%p2857_p5), %s3510_s18, 1024, %s3508_s28, %s3519_s17, %s2762_s21, %s2762_s21, %s2763_s27  }
 0x41a PF: > { %p2302_p1 = scmp.ge.s32.totalorder %s2755_s16, 2  ;;  %s2043_s12 = sand.u32 1, %s2743_s13  }
 0x41b   : > { %s2044_s29 = scalar_lea.sflag [#allocation4], %s2043_s12 }
 0x41c   : > { %p2299_p2 = pnand %p2302_p1, %p2861_p6 }
 0x41e   : > { %2738 = dma.done.wait (!%p2299_p2), %s2044_s29, 1024  }
 0x41f   : > { %2740 = vsyncadd (!%p2299_p2), %s2044_s29, 4294966272  ;;  %p20_p3 = scmp.ge.s32.totalorder %s2844_s19, 4   ;;  %s3579_s13 = smov %s2747_s14 }
 0x420   : > { %s3580_s14 = smov %s2751_s15  ;;  %s3581_s15 = smov %s2855_s22 }
 0x421   : > { %s3582_s16 = smov %s2844_s19  ;;  %22 = sbr.rel (!%p20_p3) target bundleno = 3 (0x3), region = 101 }
 0x428   :  { %2049 = vsyncpa [#allocation4], 1 }
 0x429   :  { %2051 = vsyncpa [#allocation4 + $0x1], 1 }

</bundles_post_ra>
